<compile_context>
chip_gen: v5e
topology: v5e:2x2
jax: 0.10.0
libtpu: 0.0.40
codegen_flags: <defaults>
</compile_context>

<pallas_src>
import functools

import jax
import jax.numpy as jnp
from jax.experimental import pallas as pl
from jax.experimental.pallas import tpu as pltpu


def _round_up(x, m):
    return ((x + m - 1) // m) * m


# ----------------------------------------------------------------------------
# Fused kernel: conv1 + ReLU + 1x1 conv + AvgPool2d(7,1) + view + classifier
#   grid = (Np // tn,)  -- streams the lane-padded classifier weight in
#   tn-lane tiles; features/pool computed once at j == 0 into VMEM scratch.
# ----------------------------------------------------------------------------
def _densenet_head_kernel(cols_ref, w1_ref, b1_ref, w2_ref, b2_ref,
                          wc_ref, bc_ref, o_ref, feat_ref, pooled_ref,
                          *, inv_hw):
    @pl.when(pl.program_id(0) == 0)
    def _features_and_pool():
        # conv1 (3x3, stride 2) as im2col matmul + bias + ReLU (bf16 MXU, f32 acc)
        f1 = jnp.dot(cols_ref[...], w1_ref[...],
                     preferred_element_type=jnp.float32) + b1_ref[...]
        f1 = jnp.maximum(f1, 0.0).astype(jnp.bfloat16)              # (49, 128)
        # conv2 (1x1) == per-pixel channel matmul; feature map stays in VMEM.
        # TODO(synk): register_hook/activations_hook has no forward compute;
        # feat_ref is where GradCAM activations would be written out if needed.
        feat_ref[...] = jnp.dot(f1, w2_ref[...],
                                preferred_element_type=jnp.float32) + b2_ref[...]
        # AvgPool2d(7, 1) over the full 7x7 map + view((1, 1024)).
        # The spec forward pools features_conv output directly (no extra ReLU).
        pooled_ref[...] = (jnp.sum(feat_ref[...], axis=0, keepdims=True)
                           * inv_hw).astype(pooled_ref.dtype)

    # Classifier tile: (1,1024) @ (1024, tn) + bias -> lane-dense (1, tn) store.
    o_ref[...] = (jnp.dot(pooled_ref[...], wc_ref[...],
                          preferred_element_type=jnp.float32) + bc_ref[...])


def pallas_densenet_head(cols, w1, b1, w2, b2, wc, bc, *, hw, tn=256):
    M, Kp = cols.shape           # (49, 32)  -- im2col rows x padded taps
    _, C1 = w1.shape             # (32, 128)
    _, C2 = w2.shape             # (128, 1024)
    D, Np = wc.shape             # (1024, 1024)  lane-padded classifier
    assert Np % tn == 0 and D == C2
    return pl.pallas_call(
        functools.partial(_densenet_head_kernel, inv_hw=1.0 / hw),
        out_shape=jax.ShapeDtypeStruct((1, Np), jnp.float32),
        grid=(Np // tn,),
        in_specs=[
            pl.BlockSpec((M, Kp), lambda j: (0, 0)),    # im2col patches
            pl.BlockSpec((Kp, C1), lambda j: (0, 0)),   # conv1 weight
            pl.BlockSpec((1, C1), lambda j: (0, 0)),    # conv1 bias
            pl.BlockSpec((C1, C2), lambda j: (0, 0)),   # conv2 (1x1) weight
            pl.BlockSpec((1, C2), lambda j: (0, 0)),    # conv2 bias
            pl.BlockSpec((D, tn), lambda j: (0, j)),    # streamed classifier W
            pl.BlockSpec((1, tn), lambda j: (0, j)),    # classifier bias tile
        ],
        out_specs=pl.BlockSpec((1, tn), lambda j: (0, j)),
        scratch_shapes=[
            pltpu.VMEM((M, C2), jnp.float32),    # feature map (GradCAM acts)
            pltpu.VMEM((1, C2), jnp.bfloat16),   # pooled vector, reused per j
        ],
        compiler_params=pltpu.CompilerParams(
            dimension_semantics=("arbitrary",)),   # j carries the pooled scratch
    )(cols, w1, b1, w2, b2, wc, bc)


# ----------------------------------------------------------------------------
# Plain-JAX glue
# ----------------------------------------------------------------------------
def _im2col(x_nhwc, kh, kw, *, stride, pad):
    # TODO(synk): at full DenseNet-121 sizes fold this patch gather into the
    # conv kernel's grid (per-(kh,kw) tap accumulation / Element-offset
    # index_map) to avoid materializing the kh*kw-expanded buffer in HBM.
    x = jnp.pad(x_nhwc, ((0, 0), (pad, pad), (pad, pad), (0, 0)))
    n, hp, wp, c = x.shape
    ho = (hp - kh) // stride + 1
    wo = (wp - kw) // stride + 1
    patches = []
    for i in range(kh):
        for j in range(kw):
            patches.append(
                jax.lax.slice(
                    x,
                    (0, i, j, 0),
                    (n, i + (ho - 1) * stride + 1, j + (wo - 1) * stride + 1, c),
                    (1, stride, stride, 1),
                )
            )
    cols = jnp.concatenate(patches, axis=-1)          # (n, ho, wo, kh*kw*c)
    return cols.reshape(n * ho * wo, kh * kw * c), (n, ho, wo)


# ----------------------------------------------------------------------------
# One-time weight preparation (all padding / relayout / casts hoisted here)
# ----------------------------------------------------------------------------
def prepare_params(raw):
    def conv_mat(w_oihw, k_pad_to=None):
        cout = w_oihw.shape[0]
        # (Cout,Cin,KH,KW) -> (KH,KW,Cin,Cout) -> (KH*KW*Cin, Cout); matches
        # the (i, j, channel) column order produced by _im2col.
        w = jnp.transpose(w_oihw, (2, 3, 1, 0)).reshape(-1, cout)
        if k_pad_to is not None and w.shape[0] < k_pad_to:
            w = jnp.pad(w, ((0, k_pad_to - w.shape[0]), (0, 0)))
        return w.astype(jnp.bfloat16)

    k1 = raw["conv1_w"].shape[1] * raw["conv1_w"].shape[2] * raw["conv1_w"].shape[3]
    kp = _round_up(k1, 16)                              # 27 -> 32 (bf16 sublane pack)

    n_cls, feat = raw["cls_w"].shape                    # torch Linear: (out, in)
    n_pad = _round_up(n_cls, 128)                       # 1000 -> 1024 lanes
    wc = jnp.zeros((feat, n_pad), jnp.bfloat16).at[:, :n_cls].set(
        raw["cls_w"].T.astype(jnp.bfloat16))
    bc = jnp.zeros((1, n_pad), jnp.float32).at[:, :n_cls].set(raw["cls_b"])

    return {
        "conv1_w": conv_mat(raw["conv1_w"], k_pad_to=kp),              # (32, 128) bf16
        "conv1_b": raw["conv1_b"].reshape(1, -1).astype(jnp.float32),  # (1, 128)
        "conv2_w": conv_mat(raw["conv2_w"]),                           # (128, 1024) bf16
        "conv2_b": raw["conv2_b"].reshape(1, -1).astype(jnp.float32),  # (1, 1024)
        "cls_w": wc,                                                   # (1024, 1024) bf16
        "cls_b": bc,                                                   # (1, 1024) f32
    }


# ----------------------------------------------------------------------------
# DenseNet (GradCAM wrapper) forward
# ----------------------------------------------------------------------------
@functools.partial(jax.jit, static_argnames=("num_classes",))
def densenet_forward(x_nchw, params, *, num_classes):
    # NCHW (PyTorch) -> NHWC, bf16 activations for the MXU.
    x = jnp.transpose(x_nchw, (0, 2, 3, 1)).astype(jnp.bfloat16)

    # self.features_conv(x): must yield (1, 1024, 7, 7) feature maps.
    # TODO(synk): the full DenseNet-121 `features` backbone (dense blocks,
    # BatchNorm, transitions) is abbreviated to a 2-conv Pallas proxy that
    # honours the (1, 1024, 7, 7) output contract of x.view((1, 1024)).
    cols, (n, ho, wo) = _im2col(x, 3, 3, stride=2, pad=1)          # (49, 27)
    kp = params["conv1_w"].shape[0]
    if cols.shape[1] < kp:                                          # 27 -> 32
        cols = jnp.pad(cols, ((0, 0), (0, kp - cols.shape[1])))

    # Fused: conv1+ReLU, 1x1 conv, AvgPool2d(7,1), view((1,1024)), classifier.
    logits_padded = pallas_densenet_head(
        cols, params["conv1_w"], params["conv1_b"],
        params["conv2_w"], params["conv2_b"],
        params["cls_w"], params["cls_b"], hw=ho * wo)               # (1, 1024)
    return logits_padded[:, :num_classes]                           # (1, 1000)


def init_params(key, num_classes=1000):
    k1, k2, k3, k4, k5, k6 = jax.random.split(key, 6)
    return {
        # proxy features_conv
        "conv1_w": 0.10 * jax.random.normal(k1, (128, 3, 3, 3), jnp.float32),
        "conv1_b": 0.10 * jax.random.normal(k2, (128,), jnp.float32),
        "conv2_w": 0.05 * jax.random.normal(k3, (1024, 128, 1, 1), jnp.float32),
        "conv2_b": 0.05 * jax.random.normal(k4, (1024,), jnp.float32),
        # classifier: torch.nn.Linear(1024, num_classes) -> weight (out, in)
        "cls_w": 0.02 * jax.random.normal(k5, (num_classes, 1024), jnp.float32),
        "cls_b": 0.02 * jax.random.normal(k6, (num_classes,), jnp.float32),
    }


if __name__ == "__main__":
    key = jax.random.PRNGKey(0)
    pkey, xkey = jax.random.split(key)

    raw_params = init_params(pkey, num_classes=1000)
    params = prepare_params(raw_params)   # one-time weight relayout / pad / bf16

    # Small NCHW input; the proxy backbone maps (1, 3, 14, 14) -> (1,1024,7,7),
    # matching the hard-coded x.view((1, 1024)) in the PyTorch forward.
    x = jax.random.normal(xkey, (1, 3, 14, 14), jnp.float32)

    out = densenet_forward(x, params, num_classes=1000)
    out = jax.block_until_ready(out)
    assert out.shape == (1, 1000) and out.dtype == jnp.float32
    print("KERNEL_OK")
</pallas_src>

<mosaic_0001>
module attributes {stable_mosaic.version = 11 : i64} {
  func.func @_densenet_head_kernel(%arg0: i32, %arg1: memref<49x32xbf16, #tpu.memory_space<vmem>>, %arg2: memref<32x128xbf16, #tpu.memory_space<vmem>>, %arg3: memref<1x128xf32, #tpu.memory_space<vmem>>, %arg4: memref<128x1024xbf16, #tpu.memory_space<vmem>>, %arg5: memref<1x1024xf32, #tpu.memory_space<vmem>>, %arg6: memref<1024x256xbf16, #tpu.memory_space<vmem>>, %arg7: memref<1x256xf32, #tpu.memory_space<vmem>>, %arg8: memref<1x256xf32, #tpu.memory_space<vmem>>, %arg9: memref<49x1024xf32, #tpu.memory_space<vmem>>, %arg10: memref<1x1024xbf16, #tpu.memory_space<vmem>>) attributes {dimension_semantics = [#tpu.dimension_semantics<arbitrary>], iteration_bounds = array<i64: 4>, scalar_prefetch = 0 : i64, scratch_operands = 2 : i64, tpu.core_type = #tpu.core_type<tc>, window_params = [{pipeline_mode = #tpu.pipeline_mode<synchronous>, transform_indices = @transform_0, window_bounds = array<i64: 49, 32>}, {pipeline_mode = #tpu.pipeline_mode<synchronous>, transform_indices = @transform_1, window_bounds = array<i64: 32, 128>}, {pipeline_mode = #tpu.pipeline_mode<synchronous>, transform_indices = @transform_2, window_bounds = array<i64: 1, 128>}, {pipeline_mode = #tpu.pipeline_mode<synchronous>, transform_indices = @transform_3, window_bounds = array<i64: 128, 1024>}, {pipeline_mode = #tpu.pipeline_mode<synchronous>, transform_indices = @transform_4, window_bounds = array<i64: 1, 1024>}, {transform_indices = @transform_5, window_bounds = array<i64: 1024, 256>}, {transform_indices = @transform_6, window_bounds = array<i64: 1, 256>}, {transform_indices = @transform_7, window_bounds = array<i64: 1, 256>}]} {
    %c0_i32 = arith.constant 0 : i32
    %0 = arith.cmpi eq, %arg0, %c0_i32 : i32
    %1 = arith.extui %0 : i1 to i32
    %c0_i32_0 = arith.constant 0 : i32
    %2 = arith.cmpi ne, %1, %c0_i32_0 : i32
    scf.if %2 {
      %c0_8 = arith.constant 0 : index
      %c0_9 = arith.constant 0 : index
      %9 = vector.load %arg1[%c0_8, %c0_9] : memref<49x32xbf16, #tpu.memory_space<vmem>>, vector<49x32xbf16>
      %c0_10 = arith.constant 0 : index
      %c0_11 = arith.constant 0 : index
      %10 = vector.load %arg2[%c0_10, %c0_11] : memref<32x128xbf16, #tpu.memory_space<vmem>>, vector<32x128xbf16>
      %cst_12 = arith.constant dense<0.000000e+00> : vector<49x128xf32>
      %11 = tpu.matmul %9, %10, %cst_12 {dimension_numbers = #tpu.dot_dimension_numbers<[1], [0], [0], [1], [0, 0, 1, 1], [], []>} : vector<49x32xbf16>, vector<32x128xbf16>, vector<49x128xf32> -> vector<49x128xf32>
      %c0_13 = arith.constant 0 : index
      %c0_14 = arith.constant 0 : index
      %12 = vector.load %arg3[%c0_13, %c0_14] : memref<1x128xf32, #tpu.memory_space<vmem>>, vector<1x128xf32>
      %13 = vector.broadcast %12 : vector<1x128xf32> to vector<49x128xf32>
      %14 = arith.addf %11, %13 : vector<49x128xf32>
      %cst_15 = arith.constant 0.000000e+00 : f32
      %15 = vector.broadcast %cst_15 : f32 to vector<49x128xf32>
      %16 = arith.maximumf %14, %15 : vector<49x128xf32>
      %17 = arith.truncf %16 : vector<49x128xf32> to vector<49x128xbf16>
      %c0_16 = arith.constant 0 : index
      %c0_17 = arith.constant 0 : index
      %18 = vector.load %arg4[%c0_16, %c0_17] : memref<128x1024xbf16, #tpu.memory_space<vmem>>, vector<128x1024xbf16>
      %cst_18 = arith.constant dense<0.000000e+00> : vector<49x1024xf32>
      %19 = tpu.matmul %17, %18, %cst_18 {dimension_numbers = #tpu.dot_dimension_numbers<[1], [0], [0], [1], [0, 0, 1, 1], [], []>} : vector<49x128xbf16>, vector<128x1024xbf16>, vector<49x1024xf32> -> vector<49x1024xf32>
      %c0_19 = arith.constant 0 : index
      %c0_20 = arith.constant 0 : index
      %20 = vector.load %arg5[%c0_19, %c0_20] : memref<1x1024xf32, #tpu.memory_space<vmem>>, vector<1x1024xf32>
      %21 = vector.broadcast %20 : vector<1x1024xf32> to vector<49x1024xf32>
      %22 = arith.addf %19, %21 : vector<49x1024xf32>
      %c0_21 = arith.constant 0 : index
      %c0_22 = arith.constant 0 : index
      %23 = vector.load %arg9[%c0_21, %c0_22] : memref<49x1024xf32, #tpu.memory_space<vmem>>, vector<49x1024xf32>
      tpu.vector_store %arg9[%c0_21, %c0_22], %22 {strides = array<i32>} : memref<49x1024xf32, #tpu.memory_space<vmem>>, vector<49x1024xf32>,
      %c0_23 = arith.constant 0 : index
      %c0_24 = arith.constant 0 : index
      %24 = vector.load %arg9[%c0_23, %c0_24] : memref<49x1024xf32, #tpu.memory_space<vmem>>, vector<49x1024xf32>
      %cst_25 = arith.constant dense<0.000000e+00> : vector<1024xf32>
      %25 = vector.multi_reduction <add>, %24, %cst_25 [0] : vector<49x1024xf32> to vector<1024xf32>
      %26 = vector.shape_cast %25 : vector<1024xf32> to vector<1x1024xf32>
      %cst_26 = arith.constant 0.0204081628 : f32
      %27 = vector.broadcast %cst_26 : f32 to vector<1x1024xf32>
      %28 = arith.mulf %26, %27 : vector<1x1024xf32>
      %29 = arith.truncf %28 : vector<1x1024xf32> to vector<1x1024xbf16>
      %c0_27 = arith.constant 0 : index
      %c0_28 = arith.constant 0 : index
      %30 = vector.load %arg10[%c0_27, %c0_28] : memref<1x1024xbf16, #tpu.memory_space<vmem>>, vector<1x1024xbf16>
      tpu.vector_store %arg10[%c0_27, %c0_28], %29 {strides = array<i32>} : memref<1x1024xbf16, #tpu.memory_space<vmem>>, vector<1x1024xbf16>,
    } else {
    }
    %c0 = arith.constant 0 : index
    %c0_1 = arith.constant 0 : index
    %3 = vector.load %arg10[%c0, %c0_1] : memref<1x1024xbf16, #tpu.memory_space<vmem>>, vector<1x1024xbf16>
    %c0_2 = arith.constant 0 : index
    %c0_3 = arith.constant 0 : index
    %4 = vector.load %arg6[%c0_2, %c0_3] : memref<1024x256xbf16, #tpu.memory_space<vmem>>, vector<1024x256xbf16>
    %cst = arith.constant dense<0.000000e+00> : vector<1x256xf32>
    %5 = tpu.matmul %3, %4, %cst {dimension_numbers = #tpu.dot_dimension_numbers<[1], [0], [0], [1], [0, 0, 1, 1], [], []>} : vector<1x1024xbf16>, vector<1024x256xbf16>, vector<1x256xf32> -> vector<1x256xf32>
    %c0_4 = arith.constant 0 : index
    %c0_5 = arith.constant 0 : index
    %6 = vector.load %arg7[%c0_4, %c0_5] : memref<1x256xf32, #tpu.memory_space<vmem>>, vector<1x256xf32>
    %7 = arith.addf %5, %6 : vector<1x256xf32>
    %c0_6 = arith.constant 0 : index
    %c0_7 = arith.constant 0 : index
    %8 = vector.load %arg8[%c0_6, %c0_7] : memref<1x256xf32, #tpu.memory_space<vmem>>, vector<1x256xf32>
    tpu.vector_store %arg8[%c0_6, %c0_7], %7 {strides = array<i32>} : memref<1x256xf32, #tpu.memory_space<vmem>>, vector<1x256xf32>,
    return
  }
  func.func @transform_0(%arg0: i32) -> (i32, i32) {
    %c0_i32 = arith.constant 0 : i32
    %c0_i32_0 = arith.constant 0 : i32
    %c0_i32_1 = arith.constant 0 : i32
    return %c0_i32, %c0_i32_0 : i32, i32
  }
  func.func @transform_1(%arg0: i32) -> (i32, i32) {
    %c0_i32 = arith.constant 0 : i32
    %c0_i32_0 = arith.constant 0 : i32
    %c0_i32_1 = arith.constant 0 : i32
    return %c0_i32, %c0_i32_0 : i32, i32
  }
  func.func @transform_2(%arg0: i32) -> (i32, i32) {
    %c0_i32 = arith.constant 0 : i32
    %c0_i32_0 = arith.constant 0 : i32
    %c0_i32_1 = arith.constant 0 : i32
    return %c0_i32, %c0_i32_0 : i32, i32
  }
  func.func @transform_3(%arg0: i32) -> (i32, i32) {
    %c0_i32 = arith.constant 0 : i32
    %c0_i32_0 = arith.constant 0 : i32
    %c0_i32_1 = arith.constant 0 : i32
    return %c0_i32, %c0_i32_0 : i32, i32
  }
  func.func @transform_4(%arg0: i32) -> (i32, i32) {
    %c0_i32 = arith.constant 0 : i32
    %c0_i32_0 = arith.constant 0 : i32
    %c0_i32_1 = arith.constant 0 : i32
    return %c0_i32, %c0_i32_0 : i32, i32
  }
  func.func @transform_5(%arg0: i32) -> (i32, i32) {
    %c0_i32 = arith.constant 0 : i32
    %c0_i32_0 = arith.constant 0 : i32
    return %c0_i32, %arg0 : i32, i32
  }
  func.func @transform_6(%arg0: i32) -> (i32, i32) {
    %c0_i32 = arith.constant 0 : i32
    %c0_i32_0 = arith.constant 0 : i32
    return %c0_i32, %arg0 : i32, i32
  }
  func.func @transform_7(%arg0: i32) -> (i32, i32) {
    %c0_i32 = arith.constant 0 : i32
    %c0_i32_0 = arith.constant 0 : i32
    return %c0_i32, %arg0 : i32, i32
  }
}

</mosaic_0001>

<bundles_post_ra>
// kernel: densenet_forward.1
= control target key start
LH: loop header
LB: loop body
LE: loop exit
PB: predicated region body
PF: predicated region fallthrough
CT: control target
= control target key end

     0   :  { %s4709_s0 = inlined_call_operand.vmem [shape: bf16[49,32], index: 0, kind: input, shape index: {}]   ;;  %s4710_s1 = inlined_call_operand.hbm [shape: bf16[32,128], index: 1, kind: input, shape index: {}]   ;;  %s4711_s2 = inlined_call_operand.hbm [shape: f32[1,128], index: 2, kind: input, shape index: {}]   ;;  %s4712_s3 = inlined_call_operand.hbm [shape: bf16[128,1024], index: 3, kind: input, shape index: {}]   ;;  %s4713_s4 = inlined_call_operand.hbm [shape: f32[1,1024], index: 4, kind: input, shape index: {}]   ;;  %s4714_s5 = inlined_call_operand.hbm [shape: bf16[1024,1024], index: 5, kind: input, shape index: {}]   ;;  %s4715_s6 = inlined_call_operand.hbm [shape: f32[1,1024], index: 6, kind: input, shape index: {}]   ;;  %s4716_s7 = inlined_call_operand.hbm [shape: f32[1,1024], index: 7, kind: output, shape index: {}]  }
   0x1   :  { %4722 = sst [smem:[#allocation24_spill]] %s4710_s1 }
   0x2   :  { %4723 = sst [smem:[#allocation25_spill]] %s4711_s2 }
   0x3   :  { %4724 = sst [smem:[#allocation26_spill]] %s4712_s3 }
   0x4   :  { %12 = vsyncpa [#allocation5], 0 }
   0x5   :  { %13 = vsyncpa [#allocation8], 0 }
   0x6   :  { %14 = vsyncpa [#allocation11], 0 }
   0x7   :  { %15 = vsyncpa [#allocation6], 0 }
   0x8   :  { %17 = vsyncpa [#allocation6 + $0x1], 0  ;;  %s4004_s24 = smov 0   ;;  %s4006_s25 = smov 0  }
   0x9   :  { %s4008_s26 = smov 0   ;;  %s4010_s27 = smov 0  }
   0xa LB: > { %4725 = sst [smem:[#allocation20_spill]] %s3940_s24  ;;  %s4025_s28 = sadd.s32 4294967295, %s3952_s27   ;;  %s3952_s27 = sphi %s4010_s27, %s4760_s27   ;;  %s3948_s26 = sphi %s4008_s26, %s4764_s26   ;;  %s3944_s25 = sphi %s4006_s25, %s4763_s25   ;;  %s3940_s24 = sphi %s4004_s24, %s4762_s24  }
   0xb   : > { %s2578_s29 = sadd.s32 4294967294, %s3952_s27   ;;  %s4029_s30 = sadd.s32 1, %s3952_s27  }
   0xc   : > { %4726 = sst [smem:[#allocation21_spill]] %s4029_s30  ;;  %s135_s8 = sadd.s32 1, %s3948_s26 }
   0xd   : > { %s132_s9 = ssub.s32 %s3952_s27, %s4029_s30  ;;  %p142_p0 = scmp.ne.s32.totalorder %s3948_s26, %s3944_s25 }
   0xe   : > { %p133_p1 = scmp.eq.s32.totalorder %s132_s9, 0  ;;  %p143_p2 = scmp.eq.s32.totalorder %s3952_s27, 0 }
   0xf   : > { %p148_p3 = scmp.ne.s32.totalorder %s3944_s25, %s3940_s24  ;;  %p4721_p4 = scmp.eq.s32.totalorder %s4025_s28, 0 }
  0x10   : > { %s4041_s10 = scalar_select %p133_p1, %s3948_s26, %s135_s8  }
  0x11   : > { %p4043_p5 = por %p143_p2, %p142_p0  ;;  %p4049_p6 = por %p4721_p4, %p148_p3 }
  0x12   : > { %4727 = sst [smem:[#allocation22_spill]] %s4041_s10  ;;  %p198_p7 = scmp.eq.s32.totalorder %s4025_s28, 3 }
  0x13   : > { %p204_p8 = scmp.eq.s32.totalorder %s2578_s29, 3  ;;  %p2579_p9 = scmp.ge.s32.totalorder %s3952_s27, 1 }
  0x14   : > { %p211_p10 = scmp.lt.s32.totalorder %s3952_s27, 5  ;;  %p4056_p11 = por %p198_p7, %p142_p0 }
  0x15   : > { %p4060_p12 = por %p204_p8, %p148_p3  ;;  %s4734_s1 = sld [smem:[#allocation24_spill]] }
  0x16   : > { %p4064_p13 = pnand %p2579_p9, %p211_p10  ;;  %s3954_s19 = smov [#allocation4]  }
  0x17   : > { %s4731_s14 = scalar_select %p4060_p12, 1, 0 }
  0x18   : > { %p3617_p2 = pneg %p4064_p13  ;;  %s227_s20 = sshll.u32 %s3954_s19, 4  ;;  %s228_s20 = int_to_ptr.vmem [resolvable:$true] %s227_s20 }
  0x19   : > { %4732 = sst [smem:[#allocation23_spill]] %s4731_s14  ;;  %p3645_p3 = scmp.lt.s32.totalorder %s3952_s27, 4 }
  0x1a   : > { %p4076_p0 = pnand %p3617_p2, %p4721_p4  ;;  %s3955_s22 = smov 64  }
  0x1b   : > { %s225_s18 = sshll.u32 %s4734_s1, 4  ;;  %s3956_s23 = smov 4   ;;  %s226_s18 = int_to_ptr.hbm [resolvable:$true] %s225_s18 }
  0x1c   : > { %3620 = dma.hbm_to_vmem [thread:$0]  (!%p4076_p0), %s226_s18, 256, %s228_s20, [#allocation5], %s3955_s22, %s3955_s22, %s3956_s23  }
  0x1d   : > { %p4085_p7 = pnand %p3645_p3, %p4043_p5  ;;  %s4737_s2 = sld [smem:[#allocation25_spill]] }
  0x1e   : > { %s3957_s17 = smov [#allocation7]   ;;  %s279_s1 = sand.u32 1, %s3952_s27  }
  0x1f   : > { %s242_s19 = sshll.u32 %s3957_s17, 4  ;;  %s281_s10 = sand.u32 1, %s3948_s26   ;;  %s243_s19 = int_to_ptr.vmem [resolvable:$true] %s242_s19 }
  0x20   : > { %s2585_s11 = sshll.u32 %s281_s10, 10  ;;  %s3395_s18 = sshll.u32 %s3952_s27, 3 }
  0x21   : > { %s288_s23 = scalar_lea.hbm %s4714_s5, %s3395_s18  ;;  %s283_s30 = scalar_lea.vmem [#allocation12], %s2585_s11 }
  0x22   : > { %s291_s8 = sshll.u32 %s283_s30, 4  ;;  %s289_s9 = sshll.u32 %s288_s23, 4  ;;  %s292_s8 = int_to_ptr.vmem [resolvable:$true] %s291_s8  ;;  %s290_s9 = int_to_ptr.hbm [resolvable:$true] %s289_s9 }
  0x23   : > { %s240_s16 = sshll.u32 %s4737_s2, 4  ;;  %s4738_s3 = sld [smem:[#allocation26_spill]]  ;;  %s241_s16 = int_to_ptr.hbm [resolvable:$true] %s240_s16 }
  0x24   : > { %3623 = dma.hbm_to_vmem [thread:$0]  (!%p4076_p0), %s241_s16, 16, %s243_s19, [#allocation8]  }
  0x25   : > { %s4105_s19 = scalar_lea.sflag [#allocation5], %s279_s1  ;;  %s3754_s14 = sshra.s32 %s290_s9, 4  ;;  %s3755_s14 = int_to_ptr.hbm [resolvable:$true] %s3754_s14 }
  0x26   : > { %s3756_s24 = scalar_lea.hbm %s3755_s14, 1024  ;;  %p3758_p8 = pneg %p4085_p7 }
  0x27   : > { %p3757_p5 = scmp.ne.s32.totalorder %s3755_s14, %s3756_s24  ;;  %s3761_s18 = scalar_lea.hbm %s4714_s5, 4096 }
  0x28   : > { %p3762_p2 = scmp.lt.s32.totalorder %s3755_s14, %s4714_s5  ;;  %p3763_p3 = scmp.lt.s32.totalorder %s3761_s18, %s3756_s24 }
  0x29   : > { %s251_s16 = sshll.u32 %s4738_s3, 4  ;;  %p3759_p9 = pnand %p3758_p8, %p3757_p5  ;;  %s252_s16 = int_to_ptr.hbm [resolvable:$true] %s251_s16 }
  0x2a   : > { %p3764_p1 = por %p3763_p3, %p3762_p2 }
  0x2b   : > { %p3760_p10 = pneg %p3759_p9 }
  0x2d   : > { %p3765_p4 = pnand %p3764_p1, %p3760_p10 }
  0x2f   : > { %3768 = shalt.err (!%p3765_p4)
}
  0x30   : > { %s3958_s1 = smov 512   ;;  %s3959_s2 = smov 128  }
  0x31   : > { %s3960_s23 = smov 8   ;;  %s3961_s17 = smov [#allocation9]  }
  0x32   : > { %3633 = dma.hbm_to_vmem [thread:$0]  (!%p4085_p7), %s290_s9, 16384, %s292_s8, %s4105_s19, %s3958_s1, %s3959_s2, %s3960_s23  }
  0x33   : > { %s253_s30 = sshll.u32 %s3961_s17, 4  ;;  %s266_s11 = sshll.u32 %s4713_s4, 4  ;;  %s254_s30 = int_to_ptr.vmem [resolvable:$true] %s253_s30  ;;  %s267_s11 = int_to_ptr.hbm [resolvable:$true] %s266_s11 }
  0x34   : > { %s3962_s18 = smov 32   ;;  %s3963_s20 = smov [#allocation10]  }
  0x35   : > { %3626 = dma.hbm_to_vmem [thread:$0]  (!%p4076_p0), %s252_s16, 8192, %s254_s30, [#allocation8], %s3958_s1, %s3958_s1, %s3962_s18  }
  0x36   : > { %s268_s22 = sshll.u32 %s3963_s20, 4  ;;  %s2588_s3 = sshll.u32 %s281_s10, 1  ;;  %s269_s22 = int_to_ptr.vmem [resolvable:$true] %s268_s22 }
  0x37   : > { %3629 = dma.hbm_to_vmem [thread:$0]  (!%p4076_p0), %s267_s11, 128, %s269_s22, [#allocation11]  }
  0x38   : > { %s2589_s8 = sshll.u32 %s3952_s27, 1  ;;  %s305_s9 = scalar_lea.vmem [#allocation13], %s2588_s3 }
  0x39   : > { %s313_s2 = sshll.u32 %s305_s9, 4  ;;  %s309_s14 = scalar_lea.hbm %s4715_s6, %s2589_s8  ;;  %s314_s2 = int_to_ptr.vmem [resolvable:$true] %s313_s2 }
  0x3a   : > { %s311_s24 = sshll.u32 %s309_s14, 4  ;;  %s3851_s3 = scalar_lea.hbm %s4715_s6, 8  ;;  %s312_s24 = int_to_ptr.hbm [resolvable:$true] %s311_s24 }
  0x3b   : > { %s3844_s16 = sshra.s32 %s312_s24, 4  ;;  %s3845_s16 = int_to_ptr.hbm [resolvable:$true] %s3844_s16 }
  0x3c   : > { %s3846_s1 = scalar_lea.hbm %s3845_s16, 2  ;;  %p3852_p0 = scmp.lt.s32.totalorder %s3845_s16, %s4715_s6 }
  0x3d   : > { %p3847_p4 = scmp.ne.s32.totalorder %s3845_s16, %s3846_s1  ;;  %p3853_p9 = scmp.lt.s32.totalorder %s3851_s3, %s3846_s1 }
  0x3f   : > { %p3849_p1 = pnand %p3847_p4, %p3758_p8  ;;  %p3854_p10 = por %p3853_p9, %p3852_p0 }
  0x41   : > { %p3850_p5 = pneg %p3849_p1 }
  0x43   : > { %p3855_p2 = pnand %p3854_p10, %p3850_p5 }
  0x45   : > { %3858 = shalt.err (!%p3855_p2)
}
  0x46   : > { %3636 = dma.hbm_to_vmem [thread:$0]  (!%p4085_p7), %s312_s24, 32, %s314_s2, %s4105_s19  }
  0x47   : > { %322 = sbr.rel (%p4064_p13) target bundleno = 799 (0x31f), region = 48  ;;  %p4739_p8 = scmp.eq.s32.totalorder (!%p4064_p13), %s4025_s28, 0 }
  0x4c   : > { %3919 = dma.done.wait (%p4739_p8), [#allocation5], 256   ;;  %p4740_p3 = pmov %p4739_p8 }
  0x4e   : > { %3921 = vsyncadd (%p4740_p3), [#allocation5], 4294967040  ;;  %p4741_p4 = pmov %p4740_p3 }
  0x4f   : > { %p4742_p1 = pmov %p4740_p3 }
  0x50   : > { %3923 = dma.done.wait (%p4741_p4), [#allocation8], 8208  }
  0x51   : > { %3925 = vsyncadd (%p4742_p1), [#allocation8], 4294959088  ;;  %p4743_p5 = pmov %p4742_p1 }
  0x52   : > { %p4744_p7 = pmov %p4742_p1 }
  0x53   : > { %3927 = dma.done.wait (%p4743_p5), [#allocation11], 128  }
  0x54   : > { %3929 = vsyncadd (%p4744_p7), [#allocation11], 4294967168  ;;  %s344_s15 = sand.u32 1, %s4025_s28   ;;  %s4162_s29 = sand.u32 1, %s3944_s25  }
  0x55   : > { %s2595_s19 = sshll.u32 %s4162_s29, 10  ;;  %s345_s18 = scalar_lea.sflag [#allocation5], %s344_s15 }
  0x56   : > { %s4165_s20 = scalar_lea.vmem [#allocation12], %s2595_s19 }
  0x57   : > { %3931 = dma.done.wait (%p4049_p6), %s345_s18, 16416  }
  0x58   : > { %3933 = vsyncadd (%p4049_p6), %s345_s18, 4294950880  ;;  %s2596_s22 = sshll.u32 %s4162_s29, 1  ;;  %p4745_p13 = scmp.ne.s32.totalorder %s4025_s28, 0 }
  0x59   : > { %s4172_s8 = scalar_lea.vmem [#allocation13], %s2596_s22  ;;  %s4174_s9 = scalar_lea.vmem [#allocation14], %s2596_s22 }
  0x5a   : > { %402 = sbr.rel (%p4745_p13) target bundleno = 524 (0x20c), region = 76 }
  0x5f   : > { %v3400_v0 = vld [vmem:[#allocation4 + $0x8] sm:$0xff]  ;;  %v3399_v1 = vld [vmem:[#allocation4] sm:$0xff]  ;;  %vm448_vm0 = vcmask 261120   ;;  %v2849_v2 = vld [vmem:[#allocation9 + $0x1c0] sm:$0xf]  ;;  %vm1243_vm1 = vcmask 1040384  }
  0x60   : > { %467 = vmatpush.bf16.msra.mxu0 %v3400_v0  ;;  %3593 = vmatpush.bf16.msra.mxu1 %v3400_v0  ;;  %v3461_v3 = vld [vmem:[#allocation9 + $0x1dc] sm:$0xf0]  ;;  %v3457_v4 = vld [vmem:[#allocation9 + $0x1c4] sm:$0xf]  ;;  %v3398_v6 = vld [vmem:[%s4709_s0 + $0x10] sm:$0xff]  ;;  %vm1369_vm2 = vcmask 1042434  }
  0x61   : > { %v3396_v5 = vld [vmem:[%s4709_s0] sm:$0xff]  ;;  %v2850_v7 = vor.u32 %v3461_v3, %v2849_v2  ;;  %v2857_v9 = vld [vmem:[#allocation9 + $0x1c8] sm:$0xf]  ;;  %v3458_v13 = vld [vmem:[#allocation9 + $0x1cc] sm:$0xf]  ;;  %vm1373_vm3 = vcmask 1041408  }
  0x62   : > { %v2851_v8 = vld [vmem:[#allocation9 + $0x1e0] sm:$0xf0]  ;;  %v3462_v10 = vld [vmem:[#allocation9 + $0x1e4] sm:$0xf0]  ;;  %v2859_v14 = vld [vmem:[#allocation9 + $0x1e8] sm:$0xf0] }
  0x63   : > { %v2854_v11 = vor.u32 %v3457_v4, %v2851_v8  ;;  %v2858_v12 = vor.u32 %v3462_v10, %v2857_v9  ;;  %v2817_v15 = vld [vmem:[#allocation9 + $0x180] sm:$0xf]  ;;  %v2862_v16 = vor.u32 %v3458_v13, %v2859_v14  ;;  %v3449_v18 = vld [vmem:[#allocation9 + $0x184] sm:$0xf]  ;;  %v2825_v20 = vld [vmem:[#allocation9 + $0x188] sm:$0xf] }
  0x64   : > { %v3453_v17 = vld [vmem:[#allocation9 + $0x19c] sm:$0xf0]  ;;  %v2819_v19 = vld [vmem:[#allocation9 + $0x1a0] sm:$0xf0]  ;;  %468 = vmatpush.bf16.msra.mxu0 %v3399_v1  ;;  %3594 = vmatpush.bf16.msra.mxu1 %v3399_v1  ;;  %v3454_v21 = vld [vmem:[#allocation9 + $0x1a4] sm:$0xf0] }
  0x65   : > { %v3450_v22 = vld [vmem:[#allocation9 + $0x18c] sm:$0xf]  ;;  %930 = vmatpush.bf16.msra.mxu2 %v2854_v11  ;;  %v2818_v23 = vor.u32 %v3453_v17, %v2817_v15  ;;  %v2822_v24 = vor.u32 %v3449_v18, %v2819_v19  ;;  %v2785_v26 = vld [vmem:[#allocation9 + $0x140] sm:$0xf]  ;;  %958 = vmatpush.bf16.msra.mxu3 %v2858_v12  ;;  %v2826_v28 = vor.u32 %v3454_v21, %v2825_v20  ;;  %v3441_v30 = vld [vmem:[#allocation9 + $0x144] sm:$0xf] }
  0x66   : > { %v2827_v25 = vld [vmem:[#allocation9 + $0x1a8] sm:$0xf0]  ;;  %v3445_v27 = vld [vmem:[#allocation9 + $0x15c] sm:$0xf0]  ;;  %v2787_v31 = vld [vmem:[#allocation9 + $0x160] sm:$0xf0] }
  0x67   : > { %v2830_v29 = vor.u32 %v3450_v22, %v2827_v25  ;;  %v2793_v32 = vld [vmem:[#allocation9 + $0x148] sm:$0xf]  ;;  %2619 = vmatmul.msk.bf16.vlgmr.msra.gmra.mxu0 %vm448_vm0, %v3396_v5  ;;  %2621 = vmatmul.msk.bf16.vlgmr.msra.gmra.mxu1 %vm448_vm0, %v3398_v6  ;;  %v3442_v34 = vld [vmem:[#allocation9 + $0x14c] sm:$0xf]  ;;  %v2786_v36 = vor.u32 %v3445_v27, %v2785_v26  ;;  %v2790_v37 = vor.u32 %v3441_v30, %v2787_v31  ;;  %v2753_v38 = vld [vmem:[#allocation9 + $0x100] sm:$0xf] }
  0x68   : > { %902 = vmatpush.bf16.msrb.mxu1 %v2850_v7  ;;  %986 = vmatpush.bf16.msrb.mxu0 %v2862_v16  ;;  %v3446_v33 = vld [vmem:[#allocation9 + $0x164] sm:$0xf0]  ;;  %v2795_v35 = vld [vmem:[#allocation9 + $0x168] sm:$0xf0]  ;;  %v3437_v39 = vld [vmem:[#allocation9 + $0x11c] sm:$0xf0] }
  0x69   : > { %931 = vmatpush.bf16.msra.mxu2 %v2822_v24  ;;  %v3433_v40 = vld [vmem:[#allocation9 + $0x104] sm:$0xf]  ;;  %959 = vmatpush.bf16.msra.mxu3 %v2826_v28  ;;  %v2794_v41 = vor.u32 %v3446_v33, %v2793_v32  ;;  %v2798_v42 = vor.u32 %v3442_v34, %v2795_v35  ;;  %v2761_v44 = vld [vmem:[#allocation9 + $0x108] sm:$0xf]  ;;  %v3434_v46 = vld [vmem:[#allocation9 + $0x10c] sm:$0xf]  ;;  %v2754_v49 = vor.u32 %v3437_v39, %v2753_v38 }
  0x6a   : > { %v2755_v43 = vld [vmem:[#allocation9 + $0x120] sm:$0xf0]  ;;  %v3438_v45 = vld [vmem:[#allocation9 + $0x124] sm:$0xf0]  ;;  %v2763_v47 = vld [vmem:[#allocation9 + $0x128] sm:$0xf0] }
  0x6b   : > { %v409_v48 = vld [vmem:[%s4709_s0 + $0x18] sm:$0x1]  ;;  %v2758_v50 = vor.u32 %v3433_v40, %v2755_v43  ;;  %v2762_v51 = vor.u32 %v3438_v45, %v2761_v44  ;;  %v2766_v52 = vor.u32 %v3434_v46, %v2763_v47  ;;  %v3397_v54 = vld [vmem:[%s4709_s0 + $0x8] sm:$0xff]  ;;  %v2721_v56 = vld [vmem:[#allocation9 + $0xc0] sm:$0xf]  ;;  %vm1391_vm5 = vcmask 1041409  }
  0x6c   : > { %903 = vmatpush.bf16.msrb.mxu1 %v2818_v23  ;;  %987 = vmatpush.bf16.msrb.mxu0 %v2830_v29  ;;  %v431_v53 = vunpack.c.l.b16 %v409_v48  ;;  %v3429_v57 = vld [vmem:[#allocation9 + $0xdc] sm:$0xf0]  ;;  %v3425_v58 = vld [vmem:[#allocation9 + $0xc4] sm:$0xf]  ;;  %v2729_v61 = vld [vmem:[#allocation9 + $0xc8] sm:$0xf] }
  0x6d   : > { %932 = vmatpush.bf16.msra.mxu2 %v2790_v37  ;;  %960 = vmatpush.bf16.msra.mxu3 %v2794_v41  ;;  %v2722_v59 = vor.u32 %v3429_v57, %v2721_v56  ;;  %v2723_v60 = vld [vmem:[#allocation9 + $0xe0] sm:$0xf0]  ;;  %v3430_v62 = vld [vmem:[#allocation9 + $0xe4] sm:$0xf0]  ;;  %v3426_v1 = vld [vmem:[#allocation9 + $0xcc] sm:$0xf] }
  0x6e   : > { %v435_v55 = vpack.c.b16 %v431_v53, %v431_v53  ;;  %v2726_v63 = vor.u32 %v3425_v58, %v2723_v60  ;;  %v2730_v0 = vor.u32 %v3430_v62, %v2729_v61  ;;  %v2731_v2 = vld [vmem:[#allocation9 + $0xe8] sm:$0xf0]  ;;  %v2689_v4 = vld [vmem:[#allocation9 + $0x80] sm:$0xf]  ;;  %v3417_v6 = vld [vmem:[#allocation9 + $0x84] sm:$0xf] }
  0x6f   : > { %v2734_v3 = vor.u32 %v3426_v1, %v2731_v2  ;;  %v3421_v5 = vld [vmem:[#allocation9 + $0x9c] sm:$0xf0]  ;;  %v2691_v8 = vld [vmem:[#allocation9 + $0xa0] sm:$0xf0]  ;;  %v2697_v9 = vld [vmem:[#allocation9 + $0x88] sm:$0xf] }
  0x70   : > { %904 = vmatpush.bf16.msrb.mxu1 %v2786_v36  ;;  %988 = vmatpush.bf16.msrb.mxu0 %v2798_v42  ;;  %v2690_v7 = vor.u32 %v3421_v5, %v2689_v4  ;;  %v3422_v10 = vld [vmem:[#allocation9 + $0xa4] sm:$0xf0]  ;;  %v2694_v11 = vor.u32 %v3417_v6, %v2691_v8  ;;  %v3418_v13 = vld [vmem:[#allocation9 + $0x8c] sm:$0xf]  ;;  %v2657_v16 = vld [vmem:[#allocation9 + $0x40] sm:$0xf] }
  0x71   : > { %933 = vmatpush.bf16.msra.mxu2 %v2758_v50  ;;  %961 = vmatpush.bf16.msra.mxu3 %v2762_v51  ;;  %v2698_v12 = vor.u32 %v3422_v10, %v2697_v9  ;;  %v2699_v14 = vld [vmem:[#allocation9 + $0xa8] sm:$0xf0]  ;;  %v3413_v17 = vld [vmem:[#allocation9 + $0x5c] sm:$0xf0]  ;;  %v3409_v18 = vld [vmem:[#allocation9 + $0x44] sm:$0xf] }
  0x72   : > { %v2702_v15 = vor.u32 %v3418_v13, %v2699_v14  ;;  %v2658_v19 = vor.u32 %v3413_v17, %v2657_v16  ;;  %v2659_v20 = vld [vmem:[#allocation9 + $0x60] sm:$0xf0]  ;;  %v2665_v21 = vld [vmem:[#allocation9 + $0x48] sm:$0xf]  ;;  %v3410_v25 = vld [vmem:[#allocation9 + $0x4c] sm:$0xf] }
  0x73   : > { %v3414_v22 = vld [vmem:[#allocation9 + $0x64] sm:$0xf0]  ;;  %v2662_v23 = vor.u32 %v3409_v18, %v2659_v20  ;;  %v2667_v26 = vld [vmem:[#allocation9 + $0x68] sm:$0xf0]  ;;  %v2625_v28 = vld [vmem:[#allocation9] sm:$0xf] }
  0x74   : > { %905 = vmatpush.bf16.msrb.mxu1 %v2754_v49  ;;  %989 = vmatpush.bf16.msrb.mxu0 %v2766_v52  ;;  %v2666_v24 = vor.u32 %v3414_v22, %v2665_v21  ;;  %v2670_v27 = vor.u32 %v3410_v25, %v2667_v26  ;;  %v3405_v29 = vld [vmem:[#allocation9 + $0x1c] sm:$0xf0]  ;;  %v3401_v30 = vld [vmem:[#allocation9 + $0x4] sm:$0xf]  ;;  %v2633_v33 = vld [vmem:[#allocation9 + $0x8] sm:$0xf] }
  0x75   : > { %934 = vmatpush.bf16.msra.mxu2 %v2726_v63  ;;  %962 = vmatpush.bf16.msra.mxu3 %v2730_v0  ;;  %v2626_v31 = vor.u32 %v3405_v29, %v2625_v28  ;;  %v2627_v32 = vld [vmem:[#allocation9 + $0x20] sm:$0xf0]  ;;  %v3406_v34 = vld [vmem:[#allocation9 + $0x24] sm:$0xf0]  ;;  %v3402_v37 = vld [vmem:[#allocation9 + $0xc] sm:$0xf] }
  0x76   : > { %v2630_v35 = vor.u32 %v3401_v30, %v2627_v32  ;;  %v2634_v36 = vor.u32 %v3406_v34, %v2633_v33  ;;  %v2635_v38 = vld [vmem:[#allocation9 + $0x28] sm:$0xf0]  ;;  %v3459_v40 = vld [vmem:[#allocation9 + $0x1d4] sm:$0xf]  ;;  %v2873_v42 = vld [vmem:[#allocation9 + $0x1d8] sm:$0xf] }
  0x77   : > { %2620 = vmatmul.msk.bf16.gmra.mxu0 %vm448_vm0, %v3397_v54  ;;  %2622 = vmatmul.msk.bf16.gmra.mxu1 %vm448_vm0, %v435_v55  ;;  %v2638_v39 = vor.u32 %v3402_v37, %v2635_v38  ;;  %v2867_v41 = vld [vmem:[#allocation9 + $0x1f0] sm:$0xf0]  ;;  %v3464_v44 = vld [vmem:[#allocation9 + $0x1f4] sm:$0xf0]  ;;  %v2865_v46 = vld [vmem:[#allocation9 + $0x1d0] sm:$0xf] }
  0x78   : > { %906 = vmatpush.bf16.msrb.mxu1 %v2722_v59  ;;  %990 = vmatpush.bf16.msrb.mxu0 %v2734_v3  ;;  %v2870_v43 = vor.u32 %v3459_v40, %v2867_v41  ;;  %v2874_v45 = vor.u32 %v3464_v44, %v2873_v42  ;;  %v3463_v47 = vld [vmem:[#allocation9 + $0x1ec] sm:$0xf0]  ;;  %v3460_v48 = vld [vmem:[#allocation9 + $0x1dc] sm:$0xf]  ;;  %v3451_v51 = vld [vmem:[#allocation9 + $0x194] sm:$0xf] }
  0x79   : > { %935 = vmatpush.bf16.msra.mxu2 %v2694_v11  ;;  %963 = vmatpush.bf16.msra.mxu3 %v2698_v12  ;;  %v2866_v49 = vor.u32 %v3463_v47, %v2865_v46  ;;  %v2875_v50 = vld [vmem:[#allocation9 + $0x1f8] sm:$0xf0]  ;;  %v2835_v52 = vld [vmem:[#allocation9 + $0x1b0] sm:$0xf0]  ;;  %v2841_v55 = vld [vmem:[#allocation9 + $0x198] sm:$0xf] }
  0x7a   : > { %v2878_v53 = vor.u32 %v3460_v48, %v2875_v50  ;;  %v2838_v54 = vor.u32 %v3451_v51, %v2835_v52  ;;  %v3456_v56 = vld [vmem:[#allocation9 + $0x1b4] sm:$0xf0]  ;;  %v2833_v58 = vld [vmem:[#allocation9 + $0x190] sm:$0xf]  ;;  %v3452_v60 = vld [vmem:[#allocation9 + $0x19c] sm:$0xf] }
  0x7b   : > { %v2842_v57 = vor.u32 %v3456_v56, %v2841_v55  ;;  %v3455_v59 = vld [vmem:[#allocation9 + $0x1ac] sm:$0xf0]  ;;  %v2843_v62 = vld [vmem:[#allocation9 + $0x1b8] sm:$0xf0]  ;;  %v3443_v2 = vld [vmem:[#allocation9 + $0x154] sm:$0xf] }
  0x7c   : > { %907 = vmatpush.bf16.msrb.mxu1 %v2690_v7  ;;  %991 = vmatpush.bf16.msrb.mxu0 %v2702_v15  ;;  %v2834_v61 = vor.u32 %v3455_v59, %v2833_v58  ;;  %v2846_v63 = vor.u32 %v3452_v60, %v2843_v62  ;;  %v2803_v3 = vld [vmem:[#allocation9 + $0x170] sm:$0xf0]  ;;  %v2809_v4 = vld [vmem:[#allocation9 + $0x158] sm:$0xf]  ;;  %v2801_v7 = vld [vmem:[#allocation9 + $0x150] sm:$0xf] }
  0x7d   : > { %936 = vmatpush.bf16.msra.mxu2 %v2662_v23  ;;  %964 = vmatpush.bf16.msra.mxu3 %v2666_v24  ;;  %v2806_v5 = vor.u32 %v3443_v2, %v2803_v3  ;;  %v3448_v6 = vld [vmem:[#allocation9 + $0x174] sm:$0xf0]  ;;  %v3447_v8 = vld [vmem:[#allocation9 + $0x16c] sm:$0xf0]  ;;  %v3444_v11 = vld [vmem:[#allocation9 + $0x15c] sm:$0xf] }
  0x7e   : > { %v2810_v9 = vor.u32 %v3448_v6, %v2809_v4  ;;  %v2802_v10 = vor.u32 %v3447_v8, %v2801_v7  ;;  %v2811_v12 = vld [vmem:[#allocation9 + $0x178] sm:$0xf0]  ;;  %v3435_v13 = vld [vmem:[#allocation9 + $0x114] sm:$0xf]  ;;  %v2777_v17 = vld [vmem:[#allocation9 + $0x118] sm:$0xf] }
  0x7f   : > { %v4196_v14 = vld [vmem:[#allocation7] ss:$0 sm:$0xff]  ;;  %v2814_v15 = vor.u32 %v3444_v11, %v2811_v12  ;;  %v2771_v16 = vld [vmem:[#allocation9 + $0x130] sm:$0xf0]  ;;  %v2769_v20 = vld [vmem:[#allocation9 + $0x110] sm:$0xf] }
  0x80   : > { %908 = vmatpush.bf16.msrb.mxu1 %v2658_v19  ;;  %992 = vmatpush.bf16.msrb.mxu0 %v2670_v27  ;;  %v2774_v18 = vor.u32 %v3435_v13, %v2771_v16  ;;  %v3440_v19 = vld [vmem:[#allocation9 + $0x134] sm:$0xf0]  ;;  %v3439_v21 = vld [vmem:[#allocation9 + $0x12c] sm:$0xf0]  ;;  %v3436_v24 = vld [vmem:[#allocation9 + $0x11c] sm:$0xf] }
  0x81   : > { %937 = vmatpush.bf16.msra.mxu2 %v2630_v35  ;;  %965 = vmatpush.bf16.msra.mxu3 %v2634_v36  ;;  %v2778_v22 = vor.u32 %v3440_v19, %v2777_v17  ;;  %v2770_v23 = vor.u32 %v3439_v21, %v2769_v20  ;;  %v2779_v25 = vld [vmem:[#allocation9 + $0x138] sm:$0xf0]  ;;  %v3427_v35 = vld [vmem:[#allocation9 + $0xd4] sm:$0xf]  ;;  %v2745_v37 = vld [vmem:[#allocation9 + $0xd8] sm:$0xf] }
  0x82   : > { %v2782_v26 = vor.u32 %v3436_v24, %v2779_v25  ;;  %v2739_v36 = vld [vmem:[#allocation9 + $0xf0] sm:$0xf0]  ;;  %v3432_v40 = vld [vmem:[#allocation9 + $0xf4] sm:$0xf0]  ;;  %v2737_v41 = vld [vmem:[#allocation9 + $0xd0] sm:$0xf] }
  0x83   : > { %v3431_v42 = vld [vmem:[#allocation9 + $0xec] sm:$0xf0]  ;;  %v2747_v46 = vld [vmem:[#allocation9 + $0xf8] sm:$0xf0]  ;;  %v3419_v47 = vld [vmem:[#allocation9 + $0x94] sm:$0xf] }
  0x84   : > { %909 = vmatpush.bf16.msrb.mxu1 %v2626_v31  ;;  %993 = vmatpush.bf16.msrb.mxu0 %v2638_v39  ;;  %v2742_v39 = vor.u32 %v3427_v35, %v2739_v36  ;;  %v2738_v44 = vor.u32 %v3431_v42, %v2737_v41  ;;  %v2713_v50 = vld [vmem:[#allocation9 + $0x98] sm:$0xf]  ;;  %v2715_v58 = vld [vmem:[#allocation9 + $0xb8] sm:$0xf0]  ;;  %v3411_v4 = vld [vmem:[#allocation9 + $0x54] sm:$0xf] }
  0x85   : > { %1042 = vmatpush.bf16.msrb.mxu2 %v2870_v43  ;;  %1070 = vmatpush.bf16.msrb.mxu3 %v2874_v45  ;;  %v2746_v43 = vor.u32 %v3432_v40, %v2745_v37  ;;  %v3428_v45 = vld [vmem:[#allocation9 + $0xdc] sm:$0xf]  ;;  %v3424_v52 = vld [vmem:[#allocation9 + $0xb4] sm:$0xf0]  ;;  %v3403_v16 = vld [vmem:[#allocation9 + $0x14] sm:$0xf] }
  0x86   : > { %v2750_v48 = vor.u32 %v3428_v45, %v2747_v46  ;;  %v2714_v55 = vor.u32 %v3424_v52, %v2713_v50  ;;  %v2681_v6 = vld [vmem:[#allocation9 + $0x58] sm:$0xf]  ;;  %v3412_v13 = vld [vmem:[#allocation9 + $0x5c] sm:$0xf]  ;;  %v3407_v24 = vld [vmem:[#allocation9 + $0x2c] sm:$0xf0] }
  0x87   : > { %v3416_v8 = vld [vmem:[#allocation9 + $0x74] sm:$0xf0]  ;;  %v3404_v25 = vld [vmem:[#allocation9 + $0x1c] sm:$0xf]  ;;  %vm1389_vm4 = vsmask.f32 256 }
  0x88   : > { %1014 = vmatpush.bf16.msra.mxu1 %v2866_v49  ;;  %1098 = vmatpush.bf16.msra.mxu0 %v2878_v53  ;;  %v2707_v49 = vld [vmem:[#allocation9 + $0xb0] sm:$0xf0]  ;;  %v2705_v53 = vld [vmem:[#allocation9 + $0x90] sm:$0xf]  ;;  %v2682_v11 = vor.u32 %v3416_v8, %v2681_v6  ;;  %v2649_v19 = vld [vmem:[#allocation9 + $0x18] sm:$0xf] }
  0x89   : > { %1043 = vmatpush.bf16.msrb.mxu2 %v2838_v54  ;;  %1071 = vmatpush.bf16.msrb.mxu3 %v2842_v57  ;;  %v2710_v51 = vor.u32 %v3419_v47, %v2707_v49  ;;  %v3423_v54 = vld [vmem:[#allocation9 + $0xac] sm:$0xf0]  ;;  %v3420_v57 = vld [vmem:[#allocation9 + $0x9c] sm:$0xf]  ;;  %v3408_v20 = vld [vmem:[#allocation9 + $0x34] sm:$0xf0] }
  0x8a   : > { %v2706_v56 = vor.u32 %v3423_v54, %v2705_v53  ;;  %v2718_v59 = vor.u32 %v3420_v57, %v2715_v58  ;;  %vm1392_vm6 = vsmask.f32 1280  ;;  %vm4335_vm7 = vmand %vm1243_vm1, %vm1389_vm4  ;;  %vm1396_vm9 = vsmask.f32 2304 }
  0x8b   : > { %vm4340_vm8 = vmand %vm1391_vm5, %vm1392_vm6  ;;  %vm1399_vm12 = vcmask 1043459   ;;  %vm1400_vm13 = vsmask.f32 3328  ;;  %vm1375_vm0 = vcmask 1044484   ;;  %vm1407_vm4 = vcmask 1045509  }
  0x8c   : > { %1015 = vmatpush.bf16.msra.mxu1 %v2834_v61  ;;  %1099 = vmatpush.bf16.msra.mxu0 %v2846_v63  ;;  %vm1394_vm10 = vmor %vm4340_vm8, %vm4335_vm7  ;;  %vm1408_vm5 = vsmask.f32 5376  ;;  %vm1379_vm8 = vcmask 1046534  }
  0x8d   : > { %1044 = vmatpush.bf16.msrb.mxu2 %v2806_v5  ;;  %1072 = vmatpush.bf16.msrb.mxu3 %v2810_v9  ;;  %v2675_v5 = vld [vmem:[#allocation9 + $0x70] sm:$0xf0]  ;;  %v2673_v9 = vld [vmem:[#allocation9 + $0x50] sm:$0xf]  ;;  %vm1397_vm11 = vmand %vm1369_vm2, %vm1396_vm9  ;;  %vm1412_vm9 = vsmask.f32 6400 }
  0x8e   : > { %v2678_v7 = vor.u32 %v3411_v4, %v2675_v5  ;;  %vm4357_vm14 = vmor %vm1397_vm11, %vm1394_vm10 }
  0x8f   : > { %vm4361_vm15 = vmand %vm1399_vm12, %vm1400_vm13  ;;  %vm1415_vm12 = vcmask 1047559   ;;  %vm1416_vm13 = vsmask.f32 7424 }
  0x90   : > { %1016 = vmatpush.bf16.msra.mxu1 %v2802_v10  ;;  %1100 = vmatpush.bf16.msra.mxu0 %v2814_v15  ;;  %v3415_v10 = vld [vmem:[#allocation9 + $0x6c] sm:$0xf0]  ;;  %v2683_v15 = vld [vmem:[#allocation9 + $0x78] sm:$0xf0]  ;;  %vm4374_vm7 = vmand %vm1407_vm4, %vm1408_vm5 }
  0x91   : > { %1045 = vmatpush.bf16.msrb.mxu2 %v2774_v18  ;;  %1073 = vmatpush.bf16.msrb.mxu3 %v2778_v22  ;;  %v2674_v12 = vor.u32 %v3415_v10, %v2673_v9  ;;  %v2686_v17 = vor.u32 %v3412_v13, %v2683_v15  ;;  %v2643_v18 = vld [vmem:[#allocation9 + $0x30] sm:$0xf0]  ;;  %v2650_v22 = vor.u32 %v3408_v20, %v2649_v19  ;;  %vm1413_vm11 = vmand %vm1379_vm8, %vm1412_vm9 }
  0x92   : > { %v2646_v21 = vor.u32 %v3403_v16, %v2643_v18 }
  0x94   : > { %1017 = vmatpush.bf16.msra.mxu1 %v2770_v23  ;;  %1101 = vmatpush.bf16.msra.mxu0 %v2782_v26  ;;  %v2641_v23 = vld [vmem:[#allocation9 + $0x10] sm:$0xf] }
  0x95   : > { %1046 = vmatpush.bf16.msrb.mxu2 %v2742_v39  ;;  %1074 = vmatpush.bf16.msrb.mxu3 %v2746_v43 }
  0x98   : > { %1018 = vmatpush.bf16.msra.mxu1 %v2738_v44  ;;  %1102 = vmatpush.bf16.msra.mxu0 %v2750_v48 }
  0x99   : > { %1047 = vmatpush.bf16.msrb.mxu2 %v2710_v51  ;;  %1075 = vmatpush.bf16.msrb.mxu3 %v2714_v55 }
  0x9c   : > { %1019 = vmatpush.bf16.msra.mxu1 %v2706_v56  ;;  %1103 = vmatpush.bf16.msra.mxu0 %v2718_v59 }
  0x9d   : > { %1048 = vmatpush.bf16.msrb.mxu2 %v2678_v7  ;;  %1076 = vmatpush.bf16.msrb.mxu3 %v2682_v11 }
  0xa0   : > { %1020 = vmatpush.bf16.msra.mxu1 %v2674_v12  ;;  %1104 = vmatpush.bf16.msra.mxu0 %v2686_v17 }
  0xa1   : > { %1049 = vmatpush.bf16.msrb.mxu2 %v2646_v21  ;;  %1077 = vmatpush.bf16.msrb.mxu3 %v2650_v22 }
  0xe4   : > { %v470_v0 = vpop.f32.mrf.mxu0  ;;  %v4194_v1 = vpop.f32.mrf.mxu1 }
  0xe5   : > { %v471_v27 = vadd.f32 %v4196_v14, %v470_v0  ;;  %v481_v26 = vadd.f32 %v4196_v14, %v4194_v1 }
  0xe7   : > { %v489_v31 = vmax.f32 %v471_v27, 0.0 }
  0xec   : > { %v472_v28 = vpop.f32.mrf.mxu0  ;;  %v4199_v29 = vpop.f32.mrf.mxu1 }
  0xed   : > { %v473_v30 = vadd.f32 %v4196_v14, %v472_v28  ;;  %v483_v27 = vadd.f32 %v4196_v14, %v4199_v29  ;;  %v2642_v28 = vor.u32 %v3407_v24, %v2641_v23 }
  0xef   : > { %v490_v32 = vmax.f32 %v473_v30, 0.0  ;;  %v2651_v30 = vld [vmem:[#allocation9 + $0x38] sm:$0xf0]  ;;  %1021 = vmatpush.bf16.msra.mxu1 %v2642_v28 }
  0xf1   : > { %v4202_v33 = vpack.c.bf16 %v490_v32, %v489_v31  ;;  %v2654_v31 = vor.u32 %v3404_v25, %v2651_v30  ;;  %v493_v32 = vmax.f32 %v481_v26, 0.0 }
  0xf3   : > { %910 = vmatmul.bf16.vlgmr.msrb.gmra.mxu1 %v4202_v33  ;;  %938 = vmatmul.bf16.vlgmr.msra.gmra.mxu2 %v4202_v33 }
  0xf4   : > { %966 = vmatmul.bf16.vlgmr.msra.gmra.mxu3 %v4202_v33  ;;  %994 = vmatmul.bf16.vlgmr.msrb.gmra.mxu0 %v4202_v33  ;;  %v475_v34 = vpop.f32.mrf.mxu0  ;;  %v4208_v38 = vpop.f32.mrf.mxu1 }
  0xf5   : > { %v476_v60 = vadd.f32 %v4196_v14, %v475_v34  ;;  %v494_v34 = vmax.f32 %v483_v27, 0.0  ;;  %1105 = vmatpush.bf16.msra.mxu0 %v2654_v31  ;;  %v486_v1 = vadd.f32 %v4196_v14, %v4208_v38 }
  0xf7   : > { %v491_v0 = vmax.f32 %v476_v60, 0.0  ;;  %v498_v35 = vpack.c.bf16 %v494_v34, %v493_v32  ;;  %v495_v36 = vmax.f32 %v486_v1, 0.0 }
  0xf9   : > { %v499_v29 = vpack.c.bf16 %v495_v36, %v495_v36 }
  0xfc   : > { %v477_v61 = vpop.f32.mrf.mxu0  ;;  %v487_v62 = vpop.f32.mrf.mxu1 }
  0xfd   : > { %v478_v63 = vadd.f32 %v4196_v14, %v477_v61  ;;  %v4222_v14 = vld [vmem:[#allocation10] sm:$0xff] }
  0xfe   : > { %v4225_v37 = vperm.slane %v4222_v14, 0  ;;  %v4228_v38 = vperm.slane %v4222_v14, 3  ;;  %v4233_v42 = vperm.slane %v4222_v14, 1  ;;  %v4236_v43 = vperm.slane %v4222_v14, 2 }
  0xff   : > { %v492_v2 = vmax.f32 %v478_v63, 0.0 }
 0x101   : > { %v497_v3 = vpack.c.bf16 %v492_v2, %v491_v0 }
 0x103   : > { %915 = vmatmul.bf16.gmra.mxu1 %v497_v3  ;;  %943 = vmatmul.bf16.gmra.mxu2 %v497_v3 }
 0x104   : > { %971 = vmatmul.bf16.gmra.mxu3 %v497_v3  ;;  %999 = vmatmul.bf16.gmra.mxu0 %v497_v3 }
 0x113   : > { %920 = vmatmul.bf16.gmra.mxu1 %v498_v35  ;;  %948 = vmatmul.bf16.gmra.mxu2 %v498_v35 }
 0x114   : > { %976 = vmatmul.bf16.gmra.mxu3 %v498_v35  ;;  %1004 = vmatmul.bf16.gmra.mxu0 %v498_v35 }
 0x123   : > { %925 = vmatmul.bf16.gmra.mxu1 %v499_v29  ;;  %953 = vmatmul.bf16.gmra.mxu2 %v499_v29 }
 0x124   : > { %981 = vmatmul.bf16.gmra.mxu3 %v499_v29  ;;  %1009 = vmatmul.bf16.gmra.mxu0 %v499_v29 }
 0x133   : > { %1022 = vmatmul.bf16.vlgmr.msra.gmra.mxu1 %v4202_v33  ;;  %1050 = vmatmul.bf16.vlgmr.msrb.gmra.mxu2 %v4202_v33 }
 0x134   : > { %1078 = vmatmul.bf16.vlgmr.msrb.gmra.mxu3 %v4202_v33  ;;  %1106 = vmatmul.bf16.vlgmr.msra.gmra.mxu0 %v4202_v33 }
 0x143   : > { %1027 = vmatmul.bf16.gmra.mxu1 %v497_v3  ;;  %1055 = vmatmul.bf16.gmra.mxu2 %v497_v3 }
 0x144   : > { %1083 = vmatmul.bf16.gmra.mxu3 %v497_v3  ;;  %1111 = vmatmul.bf16.gmra.mxu0 %v497_v3 }
 0x153   : > { %1032 = vmatmul.bf16.gmra.mxu1 %v498_v35  ;;  %1060 = vmatmul.bf16.gmra.mxu2 %v498_v35 }
 0x154   : > { %1088 = vmatmul.bf16.gmra.mxu3 %v498_v35  ;;  %1116 = vmatmul.bf16.gmra.mxu0 %v498_v35 }
 0x163   : > { %1037 = vmatmul.bf16.gmra.mxu1 %v499_v29  ;;  %1065 = vmatmul.bf16.gmra.mxu2 %v499_v29 }
 0x164   : > { %1093 = vmatmul.bf16.gmra.mxu3 %v499_v29  ;;  %1121 = vmatmul.bf16.gmra.mxu0 %v499_v29 }
 0x170   : > { %v911_v33 = vpop.f32.mrf.mxu1 }
 0x171   : > { %v912_v39 = vadd.f32 %v911_v33, %v4225_v37  ;;  %v995_v40 = vpop.f32.mrf.mxu0 }
 0x172   : > { %v996_v41 = vadd.f32 %v995_v40, %v4228_v38 }
 0x176   : > { %v939_v44 = vpop.f32.mrf.mxu2 }
 0x177   : > { %v940_v45 = vadd.f32 %v939_v44, %v4233_v42  ;;  %v967_v46 = vpop.f32.mrf.mxu3 }
 0x178   : > { %v968_v47 = vadd.f32 %v967_v46, %v4236_v43  ;;  %v913_v48 = vpop.f32.mrf.mxu1 }
 0x179   : > { %v914_v49 = vadd.f32 %v913_v48, %v4225_v37  ;;  %v997_v50 = vpop.f32.mrf.mxu0 }
 0x17a   : > { %v998_v51 = vadd.f32 %v997_v50, %v4228_v38 }
 0x17b   : > { %v1238_v52 = vadd.f32 %v914_v49, %v912_v39 }
 0x17c   : > { %v1278_v53 = vadd.f32 %v998_v51, %v996_v41 }
 0x17e   : > { %v941_v54 = vpop.f32.mrf.mxu2 }
 0x17f   : > { %v942_v55 = vadd.f32 %v941_v54, %v4233_v42  ;;  %v969_v56 = vpop.f32.mrf.mxu3 }
 0x180   : > { %v970_v57 = vadd.f32 %v969_v56, %v4236_v43  ;;  %v916_v58 = vpop.f32.mrf.mxu1 }
 0x181   : > { %v1252_v59 = vadd.f32 %v942_v55, %v940_v45  ;;  %v917_v60 = vadd.f32 %v916_v58, %v4225_v37  ;;  %v1000_v61 = vpop.f32.mrf.mxu0 }
 0x182   : > { %v1265_v62 = vadd.f32 %v970_v57, %v968_v47  ;;  %v1001_v63 = vadd.f32 %v1000_v61, %v4228_v38 }
 0x183   : > { %v1239_v0 = vadd.f32 %v1238_v52, %v917_v60 }
 0x184   : > { %v1279_v2 = vadd.f32 %v1278_v53, %v1001_v63  ;;  %v4267_v63 = vperm.slane %v4222_v14, 4 }
 0x186   : > { %v944_v3 = vpop.f32.mrf.mxu2 }
 0x187   : > { %v945_v4 = vadd.f32 %v944_v3, %v4233_v42  ;;  %v972_v5 = vpop.f32.mrf.mxu3 }
 0x188   : > { %v973_v6 = vadd.f32 %v972_v5, %v4236_v43  ;;  %v918_v7 = vpop.f32.mrf.mxu1 }
 0x189   : > { %v1253_v8 = vadd.f32 %v1252_v59, %v945_v4  ;;  %v919_v9 = vadd.f32 %v918_v7, %v4225_v37  ;;  %v1002_v10 = vpop.f32.mrf.mxu0 }
 0x18a   : > { %v1266_v11 = vadd.f32 %v1265_v62, %v973_v6  ;;  %v1003_v12 = vadd.f32 %v1002_v10, %v4228_v38 }
 0x18b   : > { %v1240_v13 = vadd.f32 %v1239_v0, %v919_v9 }
 0x18c   : > { %v1280_v15 = vadd.f32 %v1279_v2, %v1003_v12  ;;  %v4270_v2 = vperm.slane %v4222_v14, 7 }
 0x18e   : > { %v946_v16 = vpop.f32.mrf.mxu2 }
 0x18f   : > { %v947_v17 = vadd.f32 %v946_v16, %v4233_v42  ;;  %v974_v18 = vpop.f32.mrf.mxu3 }
 0x190   : > { %v975_v19 = vadd.f32 %v974_v18, %v4236_v43  ;;  %v921_v20 = vpop.f32.mrf.mxu1 }
 0x191   : > { %v1254_v21 = vadd.f32 %v1253_v8, %v947_v17  ;;  %v922_v22 = vadd.f32 %v921_v20, %v4225_v37  ;;  %v1005_v23 = vpop.f32.mrf.mxu0 }
 0x192   : > { %v1267_v24 = vadd.f32 %v1266_v11, %v975_v19  ;;  %v1006_v25 = vadd.f32 %v1005_v23, %v4228_v38  ;;  %v4281_v19 = vperm.slane %v4222_v14, 5 }
 0x193   : > { %v1241_v26 = vadd.f32 %v1240_v13, %v922_v22  ;;  %v4284_v22 = vperm.slane %v4222_v14, 6 }
 0x194   : > { %v1281_v27 = vadd.f32 %v1280_v15, %v1006_v25 }
 0x196   : > { %v949_v28 = vpop.f32.mrf.mxu2 }
 0x197   : > { %v950_v30 = vadd.f32 %v949_v28, %v4233_v42  ;;  %v977_v31 = vpop.f32.mrf.mxu3 }
 0x198   : > { %v978_v32 = vadd.f32 %v977_v31, %v4236_v43  ;;  %v923_v34 = vpop.f32.mrf.mxu1 }
 0x199   : > { %v1255_v35 = vadd.f32 %v1254_v21, %v950_v30  ;;  %v924_v1 = vadd.f32 %v923_v34, %v4225_v37  ;;  %v1007_v36 = vpop.f32.mrf.mxu0 }
 0x19a   : > { %v1268_v29 = vadd.f32 %v1267_v24, %v978_v32  ;;  %v1008_v33 = vadd.f32 %v1007_v36, %v4228_v38 }
 0x19b   : > { %v1242_v39 = vadd.f32 %v1241_v26, %v924_v1 }
 0x19c   : > { %v1282_v40 = vadd.f32 %v1281_v27, %v1008_v33 }
 0x19e   : > { %v951_v41 = vpop.f32.mrf.mxu2 }
 0x19f   : > { %v952_v44 = vadd.f32 %v951_v41, %v4233_v42  ;;  %v979_v45 = vpop.f32.mrf.mxu3 }
 0x1a0   : > { %v980_v46 = vadd.f32 %v979_v45, %v4236_v43  ;;  %v926_v47 = vpop.f32.mrf.mxu1 }
 0x1a1   : > { %v1256_v48 = vadd.f32 %v1255_v35, %v952_v44  ;;  %v927_v49 = vadd.f32 %v926_v47, %v4225_v37  ;;  %v1010_v50 = vpop.f32.mrf.mxu0 }
 0x1a2   : > { %v1269_v51 = vadd.f32 %v1268_v29, %v980_v46  ;;  %v1011_v52 = vadd.f32 %v1010_v50, %v4228_v38 }
 0x1a3   : > { %1174 = vst [vmem:[#allocation2 + $0x128] sm:$0x1] %v927_v49 }
 0x1a4   : > { %1177 = vst [vmem:[#allocation2 + $0x170] sm:$0x1] %v1011_v52 }
 0x1a6   : > { %v954_v53 = vpop.f32.mrf.mxu2 }
 0x1a7   : > { %v955_v54 = vadd.f32 %v954_v53, %v4233_v42  ;;  %v982_v55 = vpop.f32.mrf.mxu3 }
 0x1a8   : > { %v983_v56 = vadd.f32 %v982_v55, %v4236_v43  ;;  %v928_v57 = vpop.f32.mrf.mxu1 }
 0x1a9   : > { %1175 = vst [vmem:[#allocation2 + $0x38] sm:$0x1] %v955_v54  ;;  %v1012_v58 = vpop.f32.mrf.mxu0 }
 0x1aa   : > { %v1230_v59 = vld [vmem:[#allocation2 + $0x128] sm:$0x1]  ;;  %1176 = vst [vmem:[#allocation2 + $0x88] sm:$0x1] %v983_v56 }
 0x1ab   : > { %v1244_v37 = vsel %vm1243_vm1, %v1230_v59, 0.0  ;;  %v1233_v60 = vld [vmem:[#allocation2 + $0x170] sm:$0x1] }
 0x1ac   : > { %v1245_v61 = vadd.f32 %v1244_v37, %v1242_v39  ;;  %v1283_v38 = vsel %vm1243_vm1, %v1233_v60, 0.0 }
 0x1ad   : > { %v1284_v62 = vadd.f32 %v1283_v38, %v1282_v40 }
 0x1ae   : > { %v1246_v42 = vrot.slane %v1245_v61, 4  ;;  %v956_v0 = vpop.f32.mrf.mxu2 }
 0x1af   : > { %v1285_v43 = vrot.slane %v1284_v62, 4  ;;  %v984_v3 = vpop.f32.mrf.mxu3 }
 0x1b0   : > { %v1247_v4 = vadd.f32 %v1246_v42, %v1245_v61  ;;  %v1231_v5 = vld [vmem:[#allocation2 + $0x38] sm:$0x1]  ;;  %v1023_v6 = vpop.f32.mrf.mxu1 }
 0x1b1   : > { %v1286_v7 = vadd.f32 %v1285_v43, %v1284_v62  ;;  %v1257_v8 = vsel %vm1243_vm1, %v1231_v5, 0.0  ;;  %v1232_v9 = vld [vmem:[#allocation2 + $0x88] sm:$0x1]  ;;  %v4274_v10 = vadd.f32 %v1023_v6, %v4267_v63  ;;  %v1107_v11 = vpop.f32.mrf.mxu0 }
 0x1b2   : > { %v1248_v12 = vrot.slane %v1247_v4, 2  ;;  %v1258_v13 = vadd.f32 %v1257_v8, %v1256_v48  ;;  %v1270_v15 = vsel %vm1243_vm1, %v1232_v9, 0.0  ;;  %v4278_v16 = vadd.f32 %v1107_v11, %v4270_v2 }
 0x1b3   : > { %v1287_v17 = vrot.slane %v1286_v7, 2  ;;  %v1271_v18 = vadd.f32 %v1270_v15, %v1269_v51 }
 0x1b4   : > { %v1249_v20 = vadd.f32 %v1248_v12, %v1247_v4  ;;  %v1259_v21 = vrot.slane %v1258_v13, 4 }
 0x1b5   : > { %v1288_v23 = vadd.f32 %v1287_v17, %v1286_v7  ;;  %v1272_v24 = vrot.slane %v1271_v18, 4 }
 0x1b6   : > { %v1260_v25 = vadd.f32 %v1259_v21, %v1258_v13  ;;  %v1051_v26 = vpop.f32.mrf.mxu2  ;;  %v1250_v31 = vrot.slane %v1249_v20, 1 }
 0x1b7   : > { %v1273_v27 = vadd.f32 %v1272_v24, %v1271_v18  ;;  %v4287_v28 = vadd.f32 %v1051_v26, %v4281_v19  ;;  %v1079_v30 = vpop.f32.mrf.mxu3  ;;  %v1289_v1 = vrot.slane %v1288_v23, 1 }
 0x1b8   : > { %v1261_v32 = vrot.slane %v1260_v25, 2  ;;  %v4290_v34 = vadd.f32 %v1079_v30, %v4284_v22  ;;  %v1025_v35 = vpop.f32.mrf.mxu1  ;;  %v1251_v41 = vadd.f32 %v1250_v31, %v1249_v20 }
 0x1b9   : > { %v1274_v36 = vrot.slane %v1273_v27, 2  ;;  %v4293_v14 = vadd.f32 %v1025_v35, %v4267_v63  ;;  %v1109_v29 = vpop.f32.mrf.mxu0  ;;  %v1290_v45 = vadd.f32 %v1289_v1, %v1288_v23 }
 0x1ba   : > { %v1262_v33 = vadd.f32 %v1261_v32, %v1260_v25  ;;  %v4296_v39 = vadd.f32 %v1109_v29, %v4270_v2  ;;  %v1343_v52 = vmul.f32 0.020408163, %v1251_v41 }
 0x1bb   : > { %v1275_v40 = vadd.f32 %v1274_v36, %v1273_v27  ;;  %v1346_v56 = vmul.f32 0.020408163, %v1290_v45 }
 0x1bc   : > { %v1263_v44 = vrot.slane %v1262_v33, 1 }
 0x1bd   : > { %v1276_v46 = vrot.slane %v1275_v40, 1 }
 0x1be   : > { %v1264_v47 = vadd.f32 %v1263_v44, %v1262_v33  ;;  %v1053_v48 = vpop.f32.mrf.mxu2 }
 0x1bf   : > { %v1277_v49 = vadd.f32 %v1276_v46, %v1275_v40  ;;  %v4299_v50 = vadd.f32 %v1053_v48, %v4281_v19  ;;  %v1081_v51 = vpop.f32.mrf.mxu3  ;;  %v1291_v46 = vadd.f32 %v4293_v14, %v4274_v10  ;;  %v1330_v48 = vadd.f32 %v4296_v39, %v4278_v16 }
 0x1c0   : > { %v1344_v53 = vmul.f32 0.020408163, %v1264_v47  ;;  %v1082_v54 = vadd.f32 %v1081_v51, %v4284_v22  ;;  %v1028_v55 = vpop.f32.mrf.mxu1 }
 0x1c1   : > { %v1345_v57 = vmul.f32 0.020408163, %v1277_v49  ;;  %v1029_v58 = vadd.f32 %v1028_v55, %v4267_v63  ;;  %v1112_v59 = vpop.f32.mrf.mxu0 }
 0x1c2   : > { %v1351_v37 = vpack.c.bf16 %v1344_v53, %v1343_v52  ;;  %v1113_v60 = vadd.f32 %v1112_v59, %v4270_v2  ;;  %v1317_v10 = vadd.f32 %v1082_v54, %v4290_v34 }
 0x1c3   : > { %v1352_v61 = vpack.c.bf16 %v1346_v56, %v1345_v57  ;;  %v1292_v49 = vadd.f32 %v1291_v46, %v1029_v58  ;;  %v1304_v57 = vadd.f32 %v4299_v50, %v4287_v28 }
 0x1c4   : > { %v1359_v38 = vrot.slane %v1351_v37, 3  ;;  %v1331_v51 = vadd.f32 %v1330_v48, %v1113_v60 }
 0x1c5   : > { %v1360_v62 = vrot.slane %v1352_v61, 6  ;;  %v1361_v42 = vrot.slane %v1352_v61, 1 }
 0x1c6   : > { %v1368_v0 = vsel %vm1243_vm1, %v1351_v37, %v1359_v38  ;;  %v1056_v43 = vpop.f32.mrf.mxu2 }
 0x1c7   : > { %v1372_v3 = vsel %vm1369_vm2, %v1360_v62, %v1361_v42  ;;  %v1057_v4 = vadd.f32 %v1056_v43, %v4281_v19  ;;  %v1084_v5 = vpop.f32.mrf.mxu3  ;;  %vm1402_vm2 = vmor %vm4361_vm15, %vm4357_vm14 }
 0x1c8   : > { %v4307_v6 = vsel %vm1373_vm3, %v1368_v0, %v1372_v3  ;;  %v1085_v7 = vadd.f32 %v1084_v5, %v4284_v22  ;;  %v1030_v8 = vpop.f32.mrf.mxu1  ;;  %vm1417_vm15 = vmand %vm1415_vm12, %vm1416_vm13 }
 0x1c9   : > { %v1031_v9 = vadd.f32 %v1030_v8, %v4267_v63  ;;  %v1114_v11 = vpop.f32.mrf.mxu0  ;;  %v1305_v59 = vadd.f32 %v1304_v57, %v1057_v4 }
 0x1ca   : > { %v1115_v12 = vadd.f32 %v1114_v11, %v4270_v2  ;;  %v1318_v37 = vadd.f32 %v1317_v10, %v1085_v7 }
 0x1cb   : > { %v1293_v52 = vadd.f32 %v1292_v49, %v1031_v9 }
 0x1cc   : > { %v1332_v55 = vadd.f32 %v1331_v51, %v1115_v12 }
 0x1ce   : > { %v1058_v13 = vpop.f32.mrf.mxu2 }
 0x1cf   : > { %v1059_v15 = vadd.f32 %v1058_v13, %v4281_v19  ;;  %v1086_v17 = vpop.f32.mrf.mxu3 }
 0x1d0   : > { %v1087_v18 = vadd.f32 %v1086_v17, %v4284_v22  ;;  %v1033_v20 = vpop.f32.mrf.mxu1 }
 0x1d1   : > { %v1034_v21 = vadd.f32 %v1033_v20, %v4267_v63  ;;  %v1117_v23 = vpop.f32.mrf.mxu0  ;;  %v1306_v54 = vadd.f32 %v1305_v59, %v1059_v15 }
 0x1d2   : > { %v1118_v24 = vadd.f32 %v1117_v23, %v4270_v2  ;;  %v1319_v38 = vadd.f32 %v1318_v37, %v1087_v18 }
 0x1d4   : > { %v1333_v39 = vadd.f32 %v1332_v55, %v1118_v24 }
 0x1d6   : > { %v1061_v25 = vpop.f32.mrf.mxu2 }
 0x1d7   : > { %v1062_v26 = vadd.f32 %v1061_v25, %v4281_v19  ;;  %v1089_v27 = vpop.f32.mrf.mxu3 }
 0x1d8   : > { %v1090_v30 = vadd.f32 %v1089_v27, %v4284_v22  ;;  %v1035_v31 = vpop.f32.mrf.mxu1 }
 0x1d9   : > { %v1036_v32 = vadd.f32 %v1035_v31, %v4267_v63  ;;  %v1119_v35 = vpop.f32.mrf.mxu0  ;;  %v1307_v43 = vadd.f32 %v1306_v54, %v1062_v26 }
 0x1da   : > { %v1120_v1 = vadd.f32 %v1119_v35, %v4270_v2  ;;  %v1320_v3 = vadd.f32 %v1319_v38, %v1090_v30 }
 0x1dc   : > { %v1334_v28 = vadd.f32 %v1333_v39, %v1120_v1 }
 0x1de   : > { %v1063_v36 = vpop.f32.mrf.mxu2 }
 0x1df   : > { %v1064_v29 = vadd.f32 %v1063_v36, %v4281_v19  ;;  %v1091_v33 = vpop.f32.mrf.mxu3 }
 0x1e0   : > { %v1092_v40 = vadd.f32 %v1091_v33, %v4284_v22  ;;  %v1038_v41 = vpop.f32.mrf.mxu1 }
 0x1e1   : > { %v1039_v44 = vadd.f32 %v1038_v41, %v4267_v63  ;;  %v1122_v45 = vpop.f32.mrf.mxu0  ;;  %v1308_v9 = vadd.f32 %v1307_v43, %v1064_v29 }
 0x1e2   : > { %v1123_v47 = vadd.f32 %v1122_v45, %v4270_v2  ;;  %v1294_v2 = vadd.f32 %v1293_v52, %v1034_v21  ;;  %v1321_v11 = vadd.f32 %v1320_v3, %v1092_v40 }
 0x1e3   : > { %1178 = vst [vmem:[#allocation2 + $0x58] sm:$0x1] %v1039_v44 }
 0x1e4   : > { %1181 = vst [vmem:[#allocation2 + $0x198] sm:$0x1] %v1123_v47  ;;  %v1295_v60 = vadd.f32 %v1294_v2, %v1036_v32 }
 0x1e6   : > { %v1066_v53 = vpop.f32.mrf.mxu2 }
 0x1e7   : > { %v1067_v56 = vadd.f32 %v1066_v53, %v4281_v19  ;;  %v1094_v63 = vpop.f32.mrf.mxu3 }
 0x1e8   : > { %v1095_v14 = vadd.f32 %v1094_v63, %v4284_v22  ;;  %v1040_v16 = vpop.f32.mrf.mxu1 }
 0x1e9   : > { %1179 = vst [vmem:[#allocation2 + $0xf0] sm:$0x1] %v1067_v56  ;;  %v1124_v58 = vpop.f32.mrf.mxu0 }
 0x1ea   : > { %v1234_v61 = vld [vmem:[#allocation2 + $0x58] sm:$0x1]  ;;  %1180 = vst [vmem:[#allocation2 + $0x30] sm:$0x1] %v1095_v14 }
 0x1eb   : > { %v1296_v22 = vsel %vm1243_vm1, %v1234_v61, 0.0  ;;  %v1237_v34 = vld [vmem:[#allocation2 + $0x198] sm:$0x1]  ;;  %v1419_v61 = vld [vmem:[#allocation3] sm:$0xff] }
 0x1ec   : > { %v1297_v62 = vadd.f32 %v1296_v22, %v1295_v60  ;;  %v1335_v42 = vsel %vm1243_vm1, %v1237_v34, 0.0 }
 0x1ed   : > { %v1336_v0 = vadd.f32 %v1335_v42, %v1334_v28 }
 0x1ee   : > { %v1298_v4 = vrot.slane %v1297_v62, 4  ;;  %v1068_v5 = vpop.f32.mrf.mxu2 }
 0x1ef   : > { %v1337_v7 = vrot.slane %v1336_v0, 4  ;;  %v1096_v8 = vpop.f32.mrf.mxu3 }
 0x1f0   : > { %v1299_v12 = vadd.f32 %v1298_v4, %v1297_v62  ;;  %v1235_v13 = vld [vmem:[#allocation2 + $0xf0] sm:$0x1] }
 0x1f1   : > { %v1338_v15 = vadd.f32 %v1337_v7, %v1336_v0  ;;  %v1309_v17 = vsel %vm1243_vm1, %v1235_v13, 0.0  ;;  %v1236_v18 = vld [vmem:[#allocation2 + $0x30] sm:$0x1] }
 0x1f2   : > { %v1300_v20 = vrot.slane %v1299_v12, 2  ;;  %v1310_v21 = vadd.f32 %v1309_v17, %v1308_v9  ;;  %v1322_v23 = vsel %vm1243_vm1, %v1236_v18, 0.0  ;;  %vm1404_vm1 = vsmask.f32 4352 }
 0x1f3   : > { %v1339_v25 = vrot.slane %v1338_v15, 2  ;;  %v1323_v26 = vadd.f32 %v1322_v23, %v1321_v11  ;;  %vm1405_vm3 = vmand %vm1375_vm0, %vm1404_vm1  ;;  %vm1383_vm1 = vcmask 1045508  }
 0x1f4   : > { %v1301_v27 = vadd.f32 %v1300_v20, %v1299_v12  ;;  %v1311_v30 = vrot.slane %v1310_v21, 4  ;;  %vm4370_vm6 = vmor %vm1405_vm3, %vm1402_vm2  ;;  %vm1385_vm2 = vcmask 1043456  }
 0x1f5   : > { %v1340_v32 = vadd.f32 %v1339_v25, %v1338_v15  ;;  %v1324_v35 = vrot.slane %v1323_v26, 4  ;;  %vm1410_vm10 = vmor %vm4374_vm7, %vm4370_vm6 }
 0x1f6   : > { %v1312_v1 = vadd.f32 %v1311_v30, %v1310_v21  ;;  %v1302_v29 = vrot.slane %v1301_v27, 1  ;;  %vm1414_vm14 = vmor %vm1413_vm11, %vm1410_vm10 }
 0x1f7   : > { %v1325_v36 = vadd.f32 %v1324_v35, %v1323_v26  ;;  %v1341_v40 = vrot.slane %v1340_v32, 1  ;;  %vm1418_vm3 = vmor %vm1417_vm15, %vm1414_vm14 }
 0x1f8   : > { %v1313_v33 = vrot.slane %v1312_v1, 2  ;;  %v1303_v47 = vadd.f32 %v1302_v29, %v1301_v27 }
 0x1f9   : > { %v1326_v41 = vrot.slane %v1325_v36, 2  ;;  %v1342_v51 = vadd.f32 %v1341_v40, %v1340_v32 }
 0x1fa   : > { %v1314_v44 = vadd.f32 %v1313_v33, %v1312_v1  ;;  %v1347_v56 = vmul.f32 0.020408163, %v1303_v47 }
 0x1fb   : > { %v1327_v46 = vadd.f32 %v1326_v41, %v1325_v36  ;;  %v1350_v57 = vmul.f32 0.020408163, %v1342_v51 }
 0x1fc   : > { %v1315_v48 = vrot.slane %v1314_v44, 1 }
 0x1fd   : > { %v1328_v52 = vrot.slane %v1327_v46, 1 }
 0x1fe   : > { %v1316_v53 = vadd.f32 %v1315_v48, %v1314_v44 }
 0x1ff   : > { %v1329_v55 = vadd.f32 %v1328_v52, %v1327_v46 }
 0x200   : > { %v1348_v63 = vmul.f32 0.020408163, %v1316_v53 }
 0x201   : > { %v1349_v10 = vmul.f32 0.020408163, %v1329_v55 }
 0x202   : > { %v1353_v2 = vpack.c.bf16 %v1348_v63, %v1347_v56 }
 0x203   : > { %v1354_v14 = vpack.c.bf16 %v1350_v57, %v1349_v10 }
 0x204   : > { %v1362_v16 = vrot.slane %v1353_v2, 4  ;;  %v1363_v39 = vrot.slane %v1353_v2, 7 }
 0x205   : > { %v1364_v58 = vrot.slane %v1354_v14, 2  ;;  %v1365_v59 = vrot.slane %v1354_v14, 5 }
 0x206   : > { %v1378_v37 = vsel %vm1375_vm0, %v1362_v16, %v1363_v39 }
 0x207   : > { %v1382_v60 = vsel %vm1379_vm8, %v1364_v58, %v1365_v59 }
 0x208   : > { %v1384_v19 = vsel %vm1383_vm1, %v1378_v37, %v1382_v60 }
 0x209   : > { %v1386_v28 = vsel %vm1385_vm2, %v4307_v6, %v1384_v19 }
 0x20a   : > { %v1420_v22 = vsel %vm1418_vm3, %v1386_v28, %v1419_v61 }
 0x20b   : > { %1421 = vst [vmem:[#allocation3] sm:$0xff] %v1420_v22 }
 0x20c PF: > { %v2937_v34 = vld [vmem:[%s4165_s20 + $0x70] sm:$0xf]  ;;  %v3480_v50 = vld [vmem:[%s4165_s20 + $0x74] sm:$0xf0]  ;;  %v2929_v5 = vld [vmem:[%s4165_s20 + $0x60] sm:$0xf] }
 0x20d   : > { %v3001_v54 = vld [vmem:[%s4165_s20 + $0xf0] sm:$0xf]  ;;  %v2938_v38 = vor.u32 %v3480_v50, %v2937_v34  ;;  %v3496_v6 = vld [vmem:[%s4165_s20 + $0xf4] sm:$0xf0]  ;;  %v3478_v8 = vld [vmem:[%s4165_s20 + $0x64] sm:$0xf0] }
 0x20e   : > { %v3065_v62 = vld [vmem:[%s4165_s20 + $0x170] sm:$0xf]  ;;  %v3512_v42 = vld [vmem:[%s4165_s20 + $0x174] sm:$0xf0]  ;;  %v3002_v0 = vor.u32 %v3496_v6, %v3001_v54  ;;  %v2993_v9 = vld [vmem:[%s4165_s20 + $0xe0] sm:$0xf]  ;;  %v2930_v12 = vor.u32 %v3478_v8, %v2929_v5 }
 0x20f   : > { %v3066_v43 = vor.u32 %v3512_v42, %v3065_v62  ;;  %v3129_v3 = vld [vmem:[%s4165_s20 + $0x1f0] sm:$0xf]  ;;  %v3528_v4 = vld [vmem:[%s4165_s20 + $0x1f4] sm:$0xf0]  ;;  %2215 = vmatpush.bf16.msra.mxu0 %v2938_v38  ;;  %v3494_v11 = vld [vmem:[%s4165_s20 + $0xe4] sm:$0xf0] }
 0x210   : > { %v3130_v7 = vor.u32 %v3528_v4, %v3129_v3  ;;  %2228 = vmatpush.bf16.msra.mxu1 %v3002_v0  ;;  %v2994_v13 = vor.u32 %v3494_v11, %v2993_v9  ;;  %v3057_v15 = vld [vmem:[%s4165_s20 + $0x160] sm:$0xf]  ;;  %v3510_v17 = vld [vmem:[%s4165_s20 + $0x164] sm:$0xf0]  ;;  %v2921_v23 = vld [vmem:[%s4165_s20 + $0x50] sm:$0xf] }
 0x211   : > { %2241 = vmatpush.bf16.msra.mxu2 %v3066_v43  ;;  %v3121_v18 = vld [vmem:[%s4165_s20 + $0x1e0] sm:$0xf]  ;;  %v3058_v20 = vor.u32 %v3510_v17, %v3057_v15  ;;  %v3526_v21 = vld [vmem:[%s4165_s20 + $0x1e4] sm:$0xf0]  ;;  %v3476_v24 = vld [vmem:[%s4165_s20 + $0x54] sm:$0xf0] }
 0x212   : > { %2254 = vmatpush.bf16.msra.mxu3 %v3130_v7  ;;  %v3122_v25 = vor.u32 %v3526_v21, %v3121_v18  ;;  %v2985_v26 = vld [vmem:[%s4165_s20 + $0xd0] sm:$0xf]  ;;  %v3492_v27 = vld [vmem:[%s4165_s20 + $0xd4] sm:$0xf0]  ;;  %v2922_v31 = vor.u32 %v3476_v24, %v2921_v23  ;;  %v2913_v33 = vld [vmem:[%s4165_s20 + $0x40] sm:$0xf] }
 0x213   : > { %v3049_v30 = vld [vmem:[%s4165_s20 + $0x150] sm:$0xf]  ;;  %2216 = vmatpush.bf16.msra.mxu0 %v2930_v12  ;;  %v3508_v32 = vld [vmem:[%s4165_s20 + $0x154] sm:$0xf0]  ;;  %v2986_v36 = vor.u32 %v3492_v27, %v2985_v26  ;;  %v3474_v40 = vld [vmem:[%s4165_s20 + $0x44] sm:$0xf0] }
 0x214   : > { %v3113_v35 = vld [vmem:[%s4165_s20 + $0x1d0] sm:$0xf]  ;;  %v3524_v1 = vld [vmem:[%s4165_s20 + $0x1d4] sm:$0xf0]  ;;  %2229 = vmatpush.bf16.msra.mxu1 %v2994_v13  ;;  %v3050_v29 = vor.u32 %v3508_v32, %v3049_v30  ;;  %v2977_v41 = vld [vmem:[%s4165_s20 + $0xc0] sm:$0xf]  ;;  %v2914_v51 = vor.u32 %v3474_v40, %v2913_v33 }
 0x215   : > { %2242 = vmatpush.bf16.msra.mxu2 %v3058_v20  ;;  %v3114_v44 = vor.u32 %v3524_v1, %v3113_v35  ;;  %v3490_v45 = vld [vmem:[%s4165_s20 + $0xc4] sm:$0xf0]  ;;  %v3041_v46 = vld [vmem:[%s4165_s20 + $0x140] sm:$0xf]  ;;  %v2905_v55 = vld [vmem:[%s4165_s20 + $0x30] sm:$0xf] }
 0x216   : > { %2255 = vmatpush.bf16.msra.mxu3 %v3122_v25  ;;  %v3506_v47 = vld [vmem:[%s4165_s20 + $0x144] sm:$0xf0]  ;;  %v3105_v48 = vld [vmem:[%s4165_s20 + $0x1c0] sm:$0xf]  ;;  %v2978_v52 = vor.u32 %v3490_v45, %v2977_v41  ;;  %v3472_v56 = vld [vmem:[%s4165_s20 + $0x34] sm:$0xf0] }
 0x217   : > { %v3522_v49 = vld [vmem:[%s4165_s20 + $0x1c4] sm:$0xf0]  ;;  %2217 = vmatpush.bf16.msra.mxu0 %v2922_v31  ;;  %v3042_v53 = vor.u32 %v3506_v47, %v3041_v46  ;;  %v2969_v63 = vld [vmem:[%s4165_s20 + $0xb0] sm:$0xf]  ;;  %v3488_v10 = vld [vmem:[%s4165_s20 + $0xb4] sm:$0xf0]  ;;  %v2906_v58 = vor.u32 %v3472_v56, %v2905_v55 }
 0x218   : > { %2230 = vmatpush.bf16.msra.mxu1 %v2986_v36  ;;  %v3106_v57 = vor.u32 %v3522_v49, %v3105_v48  ;;  %v3033_v2 = vld [vmem:[%s4165_s20 + $0x130] sm:$0xf]  ;;  %v3504_v14 = vld [vmem:[%s4165_s20 + $0x134] sm:$0xf0]  ;;  %v2970_v59 = vor.u32 %v3488_v10, %v2969_v63  ;;  %v2897_v60 = vld [vmem:[%s4165_s20 + $0x20] sm:$0xf] }
 0x219   : > { %2243 = vmatpush.bf16.msra.mxu2 %v3050_v29  ;;  %v3097_v16 = vld [vmem:[%s4165_s20 + $0x1b0] sm:$0xf]  ;;  %v3520_v39 = vld [vmem:[%s4165_s20 + $0x1b4] sm:$0xf0]  ;;  %v3034_v37 = vor.u32 %v3504_v14, %v3033_v2  ;;  %v3470_v61 = vld [vmem:[%s4165_s20 + $0x24] sm:$0xf0] }
 0x21a   : > { %2256 = vmatpush.bf16.msra.mxu3 %v3114_v44  ;;  %v2961_v19 = vld [vmem:[%s4165_s20 + $0xa0] sm:$0xf]  ;;  %v3098_v28 = vor.u32 %v3520_v39, %v3097_v16  ;;  %v3486_v22 = vld [vmem:[%s4165_s20 + $0xa4] sm:$0xf0]  ;;  %v2898_v6 = vor.u32 %v3470_v61, %v2897_v60  ;;  %v2889_v0 = vld [vmem:[%s4165_s20 + $0x10] sm:$0xf] }
 0x21b   : > { %2218 = vmatpush.bf16.msra.mxu0 %v2914_v51  ;;  %v3025_v34 = vld [vmem:[%s4165_s20 + $0x120] sm:$0xf]  ;;  %v3502_v50 = vld [vmem:[%s4165_s20 + $0x124] sm:$0xf0]  ;;  %v2962_v62 = vor.u32 %v3486_v22, %v2961_v19  ;;  %v3468_v43 = vld [vmem:[%s4165_s20 + $0x14] sm:$0xf0] }
 0x21c   : > { %2231 = vmatpush.bf16.msra.mxu1 %v2978_v52  ;;  %v3089_v54 = vld [vmem:[%s4165_s20 + $0x1a0] sm:$0xf]  ;;  %v3518_v38 = vld [vmem:[%s4165_s20 + $0x1a4] sm:$0xf0]  ;;  %v3026_v42 = vor.u32 %v3502_v50, %v3025_v34  ;;  %v2953_v3 = vld [vmem:[%s4165_s20 + $0x90] sm:$0xf]  ;;  %v2890_v12 = vor.u32 %v3468_v43, %v2889_v0 }
 0x21d   : > { %2244 = vmatpush.bf16.msra.mxu2 %v3042_v53  ;;  %v3090_v4 = vor.u32 %v3518_v38, %v3089_v54  ;;  %v3484_v5 = vld [vmem:[%s4165_s20 + $0x94] sm:$0xf0]  ;;  %v3017_v7 = vld [vmem:[%s4165_s20 + $0x110] sm:$0xf]  ;;  %v2881_v13 = vld [vmem:[%s4165_s20] sm:$0xf] }
 0x21e   : > { %2257 = vmatpush.bf16.msra.mxu3 %v3106_v57  ;;  %v3500_v8 = vld [vmem:[%s4165_s20 + $0x114] sm:$0xf0]  ;;  %v3081_v9 = vld [vmem:[%s4165_s20 + $0x190] sm:$0xf]  ;;  %v3466_v15 = vld [vmem:[%s4165_s20 + $0x4] sm:$0xf0]  ;;  %v2954_v17 = vor.u32 %v3484_v5, %v2953_v3 }
 0x21f   : > { %2219 = vmatpush.bf16.msra.mxu0 %v2906_v58  ;;  %v3516_v11 = vld [vmem:[%s4165_s20 + $0x194] sm:$0xf0]  ;;  %v3018_v18 = vor.u32 %v3500_v8, %v3017_v7  ;;  %v2945_v20 = vld [vmem:[%s4165_s20 + $0x80] sm:$0xf]  ;;  %v3482_v21 = vld [vmem:[%s4165_s20 + $0x84] sm:$0xf0]  ;;  %v2882_v35 = vor.u32 %v3466_v15, %v2881_v13 }
 0x220   : > { %2232 = vmatpush.bf16.msra.mxu1 %v2970_v59  ;;  %v3009_v23 = vld [vmem:[%s4165_s20 + $0x100] sm:$0xf]  ;;  %v3082_v24 = vor.u32 %v3516_v11, %v3081_v9  ;;  %v3498_v25 = vld [vmem:[%s4165_s20 + $0x104] sm:$0xf0]  ;;  %v3193_v30 = vld [vmem:[%s4165_s20 + $0x270] sm:$0xf]  ;;  %v2946_v33 = vor.u32 %v3482_v21, %v2945_v20 }
 0x221   : > { %2245 = vmatpush.bf16.msra.mxu2 %v3034_v37  ;;  %v3073_v26 = vld [vmem:[%s4165_s20 + $0x180] sm:$0xf]  ;;  %v3514_v27 = vld [vmem:[%s4165_s20 + $0x184] sm:$0xf0]  ;;  %v3544_v31 = vld [vmem:[%s4165_s20 + $0x274] sm:$0xf0]  ;;  %v3010_v40 = vor.u32 %v3498_v25, %v3009_v23 }
 0x222   : > { %2258 = vmatpush.bf16.msra.mxu3 %v3098_v28  ;;  %v3257_v32 = vld [vmem:[%s4165_s20 + $0x2f0] sm:$0xf]  ;;  %v3560_v1 = vld [vmem:[%s4165_s20 + $0x2f4] sm:$0xf0]  ;;  %v3074_v45 = vor.u32 %v3514_v27, %v3073_v26  ;;  %v3194_v46 = vor.u32 %v3544_v31, %v3193_v30  ;;  %v3185_v49 = vld [vmem:[%s4165_s20 + $0x260] sm:$0xf] }
 0x223   : > { %2220 = vmatpush.bf16.msra.mxu0 %v2898_v6  ;;  %v3321_v36 = vld [vmem:[%s4165_s20 + $0x370] sm:$0xf]  ;;  %v3576_v29 = vld [vmem:[%s4165_s20 + $0x374] sm:$0xf0]  ;;  %v3258_v47 = vor.u32 %v3560_v1, %v3257_v32  ;;  %v3542_v51 = vld [vmem:[%s4165_s20 + $0x264] sm:$0xf0] }
 0x224   : > { %2233 = vmatpush.bf16.msra.mxu1 %v2962_v62  ;;  %v3385_v41 = vld [vmem:[%s4165_s20 + $0x3f0] sm:$0xf]  ;;  %v3592_v44 = vld [vmem:[%s4165_s20 + $0x3f4] sm:$0xf0]  ;;  %v3322_v48 = vor.u32 %v3576_v29, %v3321_v36  ;;  %v3249_v52 = vld [vmem:[%s4165_s20 + $0x2e0] sm:$0xf]  ;;  %v3186_v2 = vor.u32 %v3542_v51, %v3185_v49 }
 0x225   : > { %2246 = vmatpush.bf16.msra.mxu2 %v3026_v42  ;;  %v3386_v53 = vor.u32 %v3592_v44, %v3385_v41  ;;  %v3558_v55 = vld [vmem:[%s4165_s20 + $0x2e4] sm:$0xf0]  ;;  %v3313_v56 = vld [vmem:[%s4165_s20 + $0x360] sm:$0xf]  ;;  %v3177_v14 = vld [vmem:[%s4165_s20 + $0x250] sm:$0xf] }
 0x226   : > { %2259 = vmatpush.bf16.msra.mxu3 %v3090_v4  ;;  %v3574_v63 = vld [vmem:[%s4165_s20 + $0x364] sm:$0xf0]  ;;  %v3377_v57 = vld [vmem:[%s4165_s20 + $0x3e0] sm:$0xf]  ;;  %v3540_v16 = vld [vmem:[%s4165_s20 + $0x254] sm:$0xf0]  ;;  %v3250_v39 = vor.u32 %v3558_v55, %v3249_v52 }
 0x227   : > { %2221 = vmatpush.bf16.msra.mxu0 %v2890_v12  ;;  %v3590_v10 = vld [vmem:[%s4165_s20 + $0x3e4] sm:$0xf0]  ;;  %v3314_v58 = vor.u32 %v3574_v63, %v3313_v56  ;;  %v3241_v59 = vld [vmem:[%s4165_s20 + $0x2d0] sm:$0xf]  ;;  %v3556_v37 = vld [vmem:[%s4165_s20 + $0x2d4] sm:$0xf0]  ;;  %v3178_v50 = vor.u32 %v3540_v16, %v3177_v14 }
 0x228   : > { %2234 = vmatpush.bf16.msra.mxu1 %v2954_v17  ;;  %v1422_v60 = vld [vmem:[#allocation3] sm:$0xff]  ;;  %v3378_v61 = vor.u32 %v3590_v10, %v3377_v57  ;;  %v3305_v19 = vld [vmem:[%s4165_s20 + $0x350] sm:$0xf]  ;;  %v3572_v28 = vld [vmem:[%s4165_s20 + $0x354] sm:$0xf0]  ;;  %v3242_v54 = vor.u32 %v3556_v37, %v3241_v59  ;;  %s3392_s10 = sshll.u32 %s4025_s28, 1 }
 0x229   : > { %2247 = vmatpush.bf16.msra.mxu2 %v3018_v18  ;;  %1553 = vst [vmem:[#allocation1] ss:$9 sm:$0xff] %v1422_v60  ;;  %v3369_v22 = vld [vmem:[%s4165_s20 + $0x3d0] sm:$0xf]  ;;  %v3588_v34 = vld [vmem:[%s4165_s20 + $0x3d4] sm:$0xf0]  ;;  %v3306_v38 = vor.u32 %v3572_v28, %v3305_v19  ;;  %s2445_s30 = scalar_lea.hbm %s4716_s7, %s3392_s10 }
 0x22a   : > { %2260 = vmatpush.bf16.msra.mxu3 %v3082_v24  ;;  %v3169_v6 = vld [vmem:[%s4165_s20 + $0x240] sm:$0xf]  ;;  %v3538_v62 = vld [vmem:[%s4165_s20 + $0x244] sm:$0xf0]  ;;  %v3370_v0 = vor.u32 %v3588_v34, %v3369_v22  ;;  %v3161_v8 = vld [vmem:[%s4165_s20 + $0x230] sm:$0xf] }
 0x22b   : > { %2222 = vmatpush.bf16.msra.mxu0 %v2882_v35  ;;  %v3233_v42 = vld [vmem:[%s4165_s20 + $0x2c0] sm:$0xf]  ;;  %v3554_v43 = vld [vmem:[%s4165_s20 + $0x2c4] sm:$0xf0]  ;;  %v3170_v9 = vor.u32 %v3538_v62, %v3169_v6  ;;  %v3536_v11 = vld [vmem:[%s4165_s20 + $0x234] sm:$0xf0] }
 0x22c   : > { %2235 = vmatpush.bf16.msra.mxu1 %v2946_v33  ;;  %v3297_v3 = vld [vmem:[%s4165_s20 + $0x340] sm:$0xf]  ;;  %v3570_v4 = vld [vmem:[%s4165_s20 + $0x344] sm:$0xf0]  ;;  %v3225_v12 = vld [vmem:[%s4165_s20 + $0x2b0] sm:$0xf]  ;;  %v3234_v15 = vor.u32 %v3554_v43, %v3233_v42  ;;  %v3162_v31 = vor.u32 %v3536_v11, %v3161_v8 }
 0x22d   : > { %2248 = vmatpush.bf16.msra.mxu2 %v3010_v40  ;;  %v3361_v5 = vld [vmem:[%s4165_s20 + $0x3c0] sm:$0xf]  ;;  %v3586_v7 = vld [vmem:[%s4165_s20 + $0x3c4] sm:$0xf0]  ;;  %v3552_v13 = vld [vmem:[%s4165_s20 + $0x2b4] sm:$0xf0]  ;;  %v3298_v17 = vor.u32 %v3570_v4, %v3297_v3 }
 0x22e   : > { %2261 = vmatpush.bf16.msra.mxu3 %v3074_v45  ;;  %v3362_v23 = vor.u32 %v3586_v7, %v3361_v5  ;;  %v3289_v24 = vld [vmem:[%s4165_s20 + $0x330] sm:$0xf]  ;;  %v3568_v25 = vld [vmem:[%s4165_s20 + $0x334] sm:$0xf0]  ;;  %v3226_v32 = vor.u32 %v3552_v13, %v3225_v12  ;;  %v3153_v1 = vld [vmem:[%s4165_s20 + $0x220] sm:$0xf] }
 0x22f   : > { %2267 = vmatpush.bf16.msrb.mxu0 %v3194_v46  ;;  %v3353_v27 = vld [vmem:[%s4165_s20 + $0x3b0] sm:$0xf]  ;;  %v3584_v30 = vld [vmem:[%s4165_s20 + $0x3b4] sm:$0xf0]  ;;  %v3290_v35 = vor.u32 %v3568_v25, %v3289_v24  ;;  %v3534_v36 = vld [vmem:[%s4165_s20 + $0x224] sm:$0xf0] }
 0x230   : > { %2280 = vmatpush.bf16.msrb.mxu1 %v3258_v47  ;;  %v4486_v18 = vld [vmem:[#allocation1 + $0x12] sm:$0xff]  ;;  %v4488_v20 = vld [vmem:[#allocation1] sm:$0xff]  ;;  %v4495_v26 = vld [vmem:[#allocation1 + $0x9] sm:$0xff]  ;;  %v3354_v33 = vor.u32 %v3584_v30, %v3353_v27  ;;  %v3154_v47 = vor.u32 %v3534_v36, %v3153_v1  ;;  %s2447_s11 = sshll.u32 %s4174_s9, 4  ;;  %s2449_s15 = sshll.u32 %s2445_s30, 4  ;;  %vm2426_vm0 = vcmask 1040384   ;;  %s2448_s11 = int_to_ptr.vmem [resolvable:$true] %s2447_s11  ;;  %s2450_s15 = int_to_ptr.hbm [resolvable:$true] %s2449_s15 }
 0x231   : > { %2293 = vmatpush.bf16.msrb.mxu2 %v3322_v48  ;;  %v4490_v21 = vld [vmem:[#allocation1 + $0x1b] sm:$0xff]  ;;  %2223 = vmatmul.bf16.vlgmr.msra.gmra.mxu0 %v4488_v20  ;;  %v3217_v29 = vld [vmem:[%s4165_s20 + $0x2a0] sm:$0xf]  ;;  %v3550_v40 = vld [vmem:[%s4165_s20 + $0x2a4] sm:$0xf0]  ;;  %s2435_s28 = scalar_lea.sflag [#allocation6], %s4162_s29 }
 0x232   : > { %2306 = vmatpush.bf16.msrb.mxu3 %v3386_v53  ;;  %2249 = vmatmul.bf16.vlgmr.msra.gmra.mxu2 %v4486_v18  ;;  %v3281_v41 = vld [vmem:[%s4165_s20 + $0x320] sm:$0xf]  ;;  %v3566_v44 = vld [vmem:[%s4165_s20 + $0x324] sm:$0xf0]  ;;  %v3218_v48 = vor.u32 %v3550_v40, %v3217_v29  ;;  %v3145_v51 = vld [vmem:[%s4165_s20 + $0x210] sm:$0xf] }
 0x233   : > { %2268 = vmatpush.bf16.msrb.mxu0 %v3186_v2  ;;  %2262 = vmatmul.bf16.vlgmr.msra.gmra.mxu3 %v4490_v21  ;;  %v3345_v45 = vld [vmem:[%s4165_s20 + $0x3a0] sm:$0xf]  ;;  %v3582_v46 = vld [vmem:[%s4165_s20 + $0x3a4] sm:$0xf0]  ;;  %v3282_v49 = vor.u32 %v3566_v44, %v3281_v41  ;;  %v3532_v52 = vld [vmem:[%s4165_s20 + $0x214] sm:$0xf0] }
 0x234   : > { %2281 = vmatpush.bf16.msrb.mxu1 %v3250_v39  ;;  %v3209_v53 = vld [vmem:[%s4165_s20 + $0x290] sm:$0xf]  ;;  %v3346_v55 = vor.u32 %v3582_v46, %v3345_v45  ;;  %v3548_v56 = vld [vmem:[%s4165_s20 + $0x294] sm:$0xf0]  ;;  %v3146_v14 = vor.u32 %v3532_v52, %v3145_v51  ;;  %v3137_v16 = vld [vmem:[%s4165_s20 + $0x200] sm:$0xf] }
 0x235   : > { %2294 = vmatpush.bf16.msrb.mxu2 %v3314_v58  ;;  %2236 = vmatmul.bf16.vlgmr.msra.gmra.mxu1 %v4495_v26  ;;  %v3273_v63 = vld [vmem:[%s4165_s20 + $0x310] sm:$0xf]  ;;  %v3564_v57 = vld [vmem:[%s4165_s20 + $0x314] sm:$0xf0]  ;;  %v3530_v39 = vld [vmem:[%s4165_s20 + $0x204] sm:$0xf0]  ;;  %v3210_v58 = vor.u32 %v3548_v56, %v3209_v53 }
 0x236   : > { %2307 = vmatpush.bf16.msrb.mxu3 %v3378_v61  ;;  %v3337_v10 = vld [vmem:[%s4165_s20 + $0x390] sm:$0xf]  ;;  %v3580_v2 = vld [vmem:[%s4165_s20 + $0x394] sm:$0xf0]  ;;  %v3274_v59 = vor.u32 %v3564_v57, %v3273_v63  ;;  %v3201_v37 = vld [vmem:[%s4165_s20 + $0x280] sm:$0xf]  ;;  %v3138_v6 = vor.u32 %v3530_v39, %v3137_v16 }
 0x237   : > { %2269 = vmatpush.bf16.msrb.mxu0 %v3178_v50  ;;  %v3546_v60 = vld [vmem:[%s4165_s20 + $0x284] sm:$0xf0]  ;;  %v3265_v61 = vld [vmem:[%s4165_s20 + $0x300] sm:$0xf]  ;;  %v3338_v19 = vor.u32 %v3580_v2, %v3337_v10  ;;  %v3479_v50 = vld [vmem:[%s4165_s20 + $0x74] sm:$0xf] }
 0x238   : > { %2282 = vmatpush.bf16.msrb.mxu1 %v3242_v54  ;;  %v3562_v28 = vld [vmem:[%s4165_s20 + $0x304] sm:$0xf0]  ;;  %v3329_v22 = vld [vmem:[%s4165_s20 + $0x380] sm:$0xf]  ;;  %v2939_v54 = vld [vmem:[%s4165_s20 + $0x78] sm:$0xf0]  ;;  %v3202_v43 = vor.u32 %v3546_v60, %v3201_v37 }
 0x239   : > { %2295 = vmatpush.bf16.msrb.mxu2 %v3306_v38  ;;  %v3578_v34 = vld [vmem:[%s4165_s20 + $0x384] sm:$0xf0]  ;;  %v3495_v38 = vld [vmem:[%s4165_s20 + $0xf4] sm:$0xf]  ;;  %v3003_v62 = vld [vmem:[%s4165_s20 + $0xf8] sm:$0xf0]  ;;  %v3266_v3 = vor.u32 %v3562_v28, %v3265_v61  ;;  %v2942_v8 = vor.u32 %v3479_v50, %v2939_v54 }
 0x23a   : > { %2308 = vmatpush.bf16.msrb.mxu3 %v3370_v0  ;;  %v3511_v42 = vld [vmem:[%s4165_s20 + $0x174] sm:$0xf]  ;;  %v3067_v0 = vld [vmem:[%s4165_s20 + $0x178] sm:$0xf0]  ;;  %v3330_v7 = vor.u32 %v3578_v34, %v3329_v22  ;;  %v3477_v12 = vld [vmem:[%s4165_s20 + $0x64] sm:$0xf] }
 0x23b   : > { %2270 = vmatpush.bf16.msrb.mxu0 %v3170_v9  ;;  %v3527_v4 = vld [vmem:[%s4165_s20 + $0x1f4] sm:$0xf]  ;;  %v3131_v5 = vld [vmem:[%s4165_s20 + $0x1f8] sm:$0xf0]  ;;  %v3006_v9 = vor.u32 %v3495_v38, %v3003_v62  ;;  %v3070_v11 = vor.u32 %v3511_v42, %v3067_v0  ;;  %v2931_v13 = vld [vmem:[%s4165_s20 + $0x68] sm:$0xf0] }
 0x23c   : > { %2283 = vmatpush.bf16.msrb.mxu1 %v3234_v15  ;;  %v3493_v15 = vld [vmem:[%s4165_s20 + $0xe4] sm:$0xf]  ;;  %v3059_v25 = vld [vmem:[%s4165_s20 + $0x168] sm:$0xf0]  ;;  %v4545_v1 = vld [vmem:[#allocation1 + $0x24] sm:$0xff]  ;;  %s3888_s19 = sshra.s32 %s2450_s15, 4  ;;  %s3889_s19 = int_to_ptr.hbm [resolvable:$true] %s3888_s19 }
 0x23d   : > { %2296 = vmatpush.bf16.msrb.mxu2 %v3298_v17  ;;  %v3134_v17 = vor.u32 %v3527_v4, %v3131_v5  ;;  %v3509_v24 = vld [vmem:[%s4165_s20 + $0x164] sm:$0xf]  ;;  %v3123_v30 = vld [vmem:[%s4165_s20 + $0x1e8] sm:$0xf0]  ;;  %v4547_v36 = vld [vmem:[#allocation1 + $0x3f] sm:$0xff]  ;;  %s3890_s18 = scalar_lea.hbm %s3889_s19, 2  ;;  %p3895_p10 = scmp.lt.s32.totalorder %s3889_s19, %s4716_s7 }
 0x23e   : > { %2309 = vmatpush.bf16.msrb.mxu3 %v3362_v23  ;;  %v2995_v23 = vld [vmem:[%s4165_s20 + $0xe8] sm:$0xf0]  ;;  %v3525_v27 = vld [vmem:[%s4165_s20 + $0x1e4] sm:$0xf]  ;;  %v2923_v40 = vld [vmem:[%s4165_s20 + $0x58] sm:$0xf0]  ;;  %p3891_p6 = scmp.ne.s32.totalorder %s3889_s19, %s3890_s18 }
 0x23f   : > { %2271 = vmatpush.bf16.msrb.mxu0 %v3162_v31  ;;  %v4542_v31 = vld [vmem:[#allocation1 + $0x36] sm:$0xff]  ;;  %v2998_v29 = vor.u32 %v3493_v15, %v2995_v23  ;;  %v3491_v41 = vld [vmem:[%s4165_s20 + $0xd4] sm:$0xf]  ;;  %v4551_v44 = vld [vmem:[#allocation1 + $0x2d] sm:$0xff]  ;;  %v3126_v45 = vor.u32 %v3525_v27, %v3123_v30 }
 0x240   : > { %2284 = vmatpush.bf16.msrb.mxu1 %v3226_v32  ;;  %v2934_v32 = vor.u32 %v3477_v12, %v2931_v13  ;;  %v2987_v46 = vld [vmem:[%s4165_s20 + $0xd8] sm:$0xf0]  ;;  %v3473_v56 = vld [vmem:[%s4165_s20 + $0x44] sm:$0xf]  ;;  %v2915_v63 = vld [vmem:[%s4165_s20 + $0x48] sm:$0xf0]  ;;  %p3892_p0 = pnand %p3891_p6, %p4056_p11 }
 0x241   : > { %2297 = vmatpush.bf16.msrb.mxu2 %v3290_v35  ;;  %v3475_v35 = vld [vmem:[%s4165_s20 + $0x54] sm:$0xf]  ;;  %v3115_v51 = vld [vmem:[%s4165_s20 + $0x1d8] sm:$0xf0]  ;;  %v2990_v53 = vor.u32 %v3491_v41, %v2987_v46  ;;  %v3489_v57 = vld [vmem:[%s4165_s20 + $0xc4] sm:$0xf] }
 0x242   : > { %2310 = vmatpush.bf16.msrb.mxu3 %v3354_v33  ;;  %v3062_v33 = vor.u32 %v3509_v24, %v3059_v25  ;;  %v2926_v52 = vor.u32 %v3475_v35, %v2923_v40  ;;  %v2979_v2 = vld [vmem:[%s4165_s20 + $0xc8] sm:$0xf0]  ;;  %v3521_v39 = vld [vmem:[%s4165_s20 + $0x1c4] sm:$0xf]  ;;  %v3471_v61 = vld [vmem:[%s4165_s20 + $0x34] sm:$0xf]  ;;  %p3893_p9 = pneg %p3892_p0 }
 0x243   : > { %2272 = vmatpush.bf16.msrb.mxu0 %v3154_v47  ;;  %v3507_v47 = vld [vmem:[%s4165_s20 + $0x154] sm:$0xf]  ;;  %v3043_v16 = vld [vmem:[%s4165_s20 + $0x148] sm:$0xf0]  ;;  %v2982_v37 = vor.u32 %v3489_v57, %v2979_v2  ;;  %v2971_v34 = vld [vmem:[%s4165_s20 + $0xb8] sm:$0xf0] }
 0x244   : > { %2285 = vmatpush.bf16.msrb.mxu1 %v3218_v48  ;;  %v3051_v48 = vld [vmem:[%s4165_s20 + $0x158] sm:$0xf0]  ;;  %v3487_v28 = vld [vmem:[%s4165_s20 + $0xb4] sm:$0xf]  ;;  %v3485_v4 = vld [vmem:[%s4165_s20 + $0xa4] sm:$0xf] }
 0x245   : > { %2298 = vmatpush.bf16.msrb.mxu2 %v3282_v49  ;;  %v3523_v49 = vld [vmem:[%s4165_s20 + $0x1d4] sm:$0xf]  ;;  %v3035_v54 = vld [vmem:[%s4165_s20 + $0x138] sm:$0xf0]  ;;  %v2974_v42 = vor.u32 %v3487_v28, %v2971_v34  ;;  %v3091_v12 = vld [vmem:[%s4165_s20 + $0x1a8] sm:$0xf0] }
 0x246   : > { %2311 = vmatpush.bf16.msrb.mxu3 %v3346_v55  ;;  %v3054_v55 = vor.u32 %v3507_v47, %v3051_v48  ;;  %v3118_v10 = vor.u32 %v3523_v49, %v3115_v51  ;;  %v3503_v50 = vld [vmem:[%s4165_s20 + $0x134] sm:$0xf]  ;;  %v2891_v24 = vld [vmem:[%s4165_s20 + $0x18] sm:$0xf0]  ;;  %v3465_v41 = vld [vmem:[%s4165_s20 + $0x4] sm:$0xf] }
 0x247   : > { %2273 = vmatpush.bf16.msrb.mxu0 %v3146_v14  ;;  %v3505_v14 = vld [vmem:[%s4165_s20 + $0x144] sm:$0xf]  ;;  %v3519_v38 = vld [vmem:[%s4165_s20 + $0x1b4] sm:$0xf]  ;;  %v3038_v0 = vor.u32 %v3503_v50, %v3035_v54  ;;  %v2955_v30 = vld [vmem:[%s4165_s20 + $0x98] sm:$0xf0] }
 0x248   : > { %2286 = vmatpush.bf16.msrb.mxu1 %v3210_v58  ;;  %v3107_v58 = vld [vmem:[%s4165_s20 + $0x1c8] sm:$0xf0]  ;;  %v3046_v60 = vor.u32 %v3505_v14, %v3043_v16  ;;  %v3467_v23 = vld [vmem:[%s4165_s20 + $0x14] sm:$0xf]  ;;  %v3019_v35 = vld [vmem:[%s4165_s20 + $0x118] sm:$0xf0] }
 0x249   : > { %2299 = vmatpush.bf16.msrb.mxu2 %v3274_v59  ;;  %v2918_v59 = vor.u32 %v3473_v56, %v2915_v63  ;;  %v3110_v22 = vor.u32 %v3521_v39, %v3107_v58  ;;  %v3483_v25 = vld [vmem:[%s4165_s20 + $0x94] sm:$0xf]  ;;  %v2894_v40 = vor.u32 %v3467_v23, %v2891_v24  ;;  %v3481_v48 = vld [vmem:[%s4165_s20 + $0x84] sm:$0xf]  ;;  %v2947_v49 = vld [vmem:[%s4165_s20 + $0x88] sm:$0xf0] }
 0x24a   : > { %2312 = vmatpush.bf16.msrb.mxu3 %v3338_v19  ;;  %v2907_v19 = vld [vmem:[%s4165_s20 + $0x38] sm:$0xf0]  ;;  %v2958_v46 = vor.u32 %v3483_v25, %v2955_v30  ;;  %v3497_v51 = vld [vmem:[%s4165_s20 + $0x104] sm:$0xf]  ;;  %v3075_v56 = vld [vmem:[%s4165_s20 + $0x188] sm:$0xf0]  ;;  %v2950_v58 = vor.u32 %v3481_v48, %v2947_v49 }
 0x24b   : > { %2274 = vmatpush.bf16.msrb.mxu0 %v3138_v6  ;;  %v3099_v6 = vld [vmem:[%s4165_s20 + $0x1b8] sm:$0xf0]  ;;  %v2910_v62 = vor.u32 %v3471_v61, %v2907_v19  ;;  %v3543_v63 = vld [vmem:[%s4165_s20 + $0x274] sm:$0xf]  ;;  %v3541_v34 = vld [vmem:[%s4165_s20 + $0x264] sm:$0xf] }
 0x24c   : > { %2287 = vmatpush.bf16.msrb.mxu1 %v3202_v43  ;;  %v3469_v43 = vld [vmem:[%s4165_s20 + $0x24] sm:$0xf]  ;;  %v3102_v5 = vor.u32 %v3519_v38, %v3099_v6  ;;  %v3195_v57 = vld [vmem:[%s4165_s20 + $0x278] sm:$0xf0]  ;;  %v3575_v16 = vld [vmem:[%s4165_s20 + $0x374] sm:$0xf] }
 0x24d   : > { %2300 = vmatpush.bf16.msrb.mxu2 %v3266_v3  ;;  %v2899_v3 = vld [vmem:[%s4165_s20 + $0x28] sm:$0xf0]  ;;  %v3259_v14 = vld [vmem:[%s4165_s20 + $0x2f8] sm:$0xf0]  ;;  %v3198_v19 = vor.u32 %v3543_v63, %v3195_v57  ;;  %v3557_v54 = vld [vmem:[%s4165_s20 + $0x2e4] sm:$0xf] }
 0x24e   : > { %2313 = vmatpush.bf16.msrb.mxu3 %v3330_v7  ;;  %2275 = vmatmul.bf16.vlgmr.msrb.gmra.mxu0 %v4545_v1  ;;  %v2963_v7 = vld [vmem:[%s4165_s20 + $0xa8] sm:$0xf0]  ;;  %v2902_v13 = vor.u32 %v3469_v43, %v2899_v3  ;;  %v3323_v39 = vld [vmem:[%s4165_s20 + $0x378] sm:$0xf0]  ;;  %v3553_v30 = vld [vmem:[%s4165_s20 + $0x2c4] sm:$0xf] }
 0x24f   : > { %2319 = vmatpush.bf16.msra.mxu0 %v2942_v8  ;;  %2288 = vmatmul.bf16.vlgmr.msrb.gmra.mxu1 %v4551_v44  ;;  %v3501_v8 = vld [vmem:[%s4165_s20 + $0x124] sm:$0xf]  ;;  %v2966_v15 = vor.u32 %v3485_v4, %v2963_v7  ;;  %v3187_v50 = vld [vmem:[%s4165_s20 + $0x268] sm:$0xf0]  ;;  %v3539_v7 = vld [vmem:[%s4165_s20 + $0x254] sm:$0xf] }
 0x250   : > { %2332 = vmatpush.bf16.msra.mxu1 %v3006_v9  ;;  %2301 = vmatmul.bf16.vlgmr.msrb.gmra.mxu2 %v4542_v31  ;;  %v3027_v9 = vld [vmem:[%s4165_s20 + $0x128] sm:$0xf0]  ;;  %v3190_v3 = vor.u32 %v3541_v34, %v3187_v50  ;;  %v3371_v23 = vld [vmem:[%s4165_s20 + $0x3d8] sm:$0xf0]  ;;  %v3551_v48 = vld [vmem:[%s4165_s20 + $0x2b4] sm:$0xf] }
 0x251   : > { %2345 = vmatpush.bf16.msra.mxu2 %v3070_v11  ;;  %2314 = vmatmul.bf16.vlgmr.msrb.gmra.mxu3 %v4547_v36  ;;  %v3517_v11 = vld [vmem:[%s4165_s20 + $0x1a4] sm:$0xf]  ;;  %v3251_v6 = vld [vmem:[%s4165_s20 + $0x2e8] sm:$0xf0]  ;;  %v3531_v34 = vld [vmem:[%s4165_s20 + $0x214] sm:$0xf] }
 0x252   : > { %2358 = vmatpush.bf16.msra.mxu3 %v3134_v17  ;;  %v3030_v17 = vor.u32 %v3501_v8, %v3027_v9  ;;  %v3094_v27 = vor.u32 %v3517_v11, %v3091_v12  ;;  %v3379_v43 = vld [vmem:[%s4165_s20 + $0x3e8] sm:$0xf0]  ;;  %v3254_v4 = vor.u32 %v3557_v54, %v3251_v6  ;;  %v3179_v8 = vld [vmem:[%s4165_s20 + $0x258] sm:$0xf0]  ;;  %v3555_v9 = vld [vmem:[%s4165_s20 + $0x2d4] sm:$0xf] }
 0x253   : > { %2320 = vmatpush.bf16.msra.mxu0 %v2934_v32  ;;  %v3499_v32 = vld [vmem:[%s4165_s20 + $0x114] sm:$0xf]  ;;  %v3243_v12 = vld [vmem:[%s4165_s20 + $0x2d8] sm:$0xf0]  ;;  %v3182_v24 = vor.u32 %v3539_v7, %v3179_v8  ;;  %v3529_v7 = vld [vmem:[%s4165_s20 + $0x204] sm:$0xf] }
 0x254   : > { %2333 = vmatpush.bf16.msra.mxu1 %v2998_v29  ;;  %v3515_v29 = vld [vmem:[%s4165_s20 + $0x194] sm:$0xf]  ;;  %v3022_v47 = vor.u32 %v3499_v32, %v3019_v35  ;;  %v3235_v35 = vld [vmem:[%s4165_s20 + $0x2c8] sm:$0xf0]  ;;  %v3147_v50 = vld [vmem:[%s4165_s20 + $0x218] sm:$0xf0] }
 0x255   : > { %2346 = vmatpush.bf16.msra.mxu2 %v3062_v33  ;;  %v3083_v33 = vld [vmem:[%s4165_s20 + $0x198] sm:$0xf0]  ;;  %v3547_v54 = vld [vmem:[%s4165_s20 + $0x294] sm:$0xf]  ;;  %v3139_v8 = vld [vmem:[%s4165_s20 + $0x208] sm:$0xf0] }
 0x256   : > { %2359 = vmatpush.bf16.msra.mxu3 %v3126_v45  ;;  %v2883_v45 = vld [vmem:[%s4165_s20 + $0x8] sm:$0xf0]  ;;  %v3211_v6 = vld [vmem:[%s4165_s20 + $0x298] sm:$0xf0] }
 0x257   : > { %2321 = vmatpush.bf16.msra.mxu0 %v2926_v52  ;;  %v3086_v52 = vor.u32 %v3515_v29, %v3083_v33  ;;  %v2886_v2 = vor.u32 %v3465_v41, %v2883_v45  ;;  %v3299_v29 = vld [vmem:[%s4165_s20 + $0x348] sm:$0xf0]  ;;  %v3585_v33 = vld [vmem:[%s4165_s20 + $0x3c4] sm:$0xf]  ;;  %v3238_v41 = vor.u32 %v3553_v30, %v3235_v35 }
 0x258   : > { %2334 = vmatpush.bf16.msra.mxu1 %v2990_v53  ;;  %v3011_v53 = vld [vmem:[%s4165_s20 + $0x108] sm:$0xf0] }
 0x259   : > { %2347 = vmatpush.bf16.msra.mxu2 %v3054_v55  ;;  %v3513_v55 = vld [vmem:[%s4165_s20 + $0x184] sm:$0xf] }
 0x25a   : > { %2360 = vmatpush.bf16.msra.mxu3 %v3118_v10  ;;  %v3559_v10 = vld [vmem:[%s4165_s20 + $0x2f4] sm:$0xf]  ;;  %v3078_v61 = vor.u32 %v3513_v55, %v3075_v56  ;;  %v3355_v56 = vld [vmem:[%s4165_s20 + $0x3b8] sm:$0xf0] }
 0x25b   : > { %2322 = vmatpush.bf16.msra.mxu0 %v2918_v59  ;;  %v3014_v59 = vor.u32 %v3497_v51, %v3011_v53  ;;  %v3262_v28 = vor.u32 %v3559_v10, %v3259_v14  ;;  %v3227_v51 = vld [vmem:[%s4165_s20 + $0x2b8] sm:$0xf0]  ;;  %v3583_v55 = vld [vmem:[%s4165_s20 + $0x3b4] sm:$0xf]  ;;  %v3155_v14 = vld [vmem:[%s4165_s20 + $0x228] sm:$0xf0] }
 0x25c   : > { %2335 = vmatpush.bf16.msra.mxu1 %v2982_v37  ;;  %v3591_v37 = vld [vmem:[%s4165_s20 + $0x3f4] sm:$0xf]  ;;  %v3291_v53 = vld [vmem:[%s4165_s20 + $0x338] sm:$0xf0]  ;;  %v3230_v57 = vor.u32 %v3551_v48, %v3227_v51 }
 0x25d   : > { %2348 = vmatpush.bf16.msra.mxu2 %v3046_v60  ;;  %v3387_v60 = vld [vmem:[%s4165_s20 + $0x3f8] sm:$0xf0] }
 0x25e   : > { %2361 = vmatpush.bf16.msra.mxu3 %v3110_v22  ;;  %v3326_v22 = vor.u32 %v3575_v16, %v3323_v39  ;;  %v3390_v38 = vor.u32 %v3591_v37, %v3387_v60  ;;  %v3549_v16 = vld [vmem:[%s4165_s20 + $0x2a4] sm:$0xf]  ;;  %v3358_v39 = vor.u32 %v3583_v55, %v3355_v56  ;;  %v3283_v37 = vld [vmem:[%s4165_s20 + $0x328] sm:$0xf0] }
 0x25f   : > { %2323 = vmatpush.bf16.msra.mxu0 %v2910_v62  ;;  %v3573_v62 = vld [vmem:[%s4165_s20 + $0x364] sm:$0xf] }
 0x260   : > { %2336 = vmatpush.bf16.msra.mxu1 %v2974_v42  ;;  %v3315_v42 = vld [vmem:[%s4165_s20 + $0x368] sm:$0xf0]  ;;  %v3581_v60 = vld [vmem:[%s4165_s20 + $0x3a4] sm:$0xf] }
 0x261   : > { %2349 = vmatpush.bf16.msra.mxu2 %v3038_v0  ;;  %v3589_v0 = vld [vmem:[%s4165_s20 + $0x3e4] sm:$0xf] }
 0x262   : > { %2362 = vmatpush.bf16.msra.mxu3 %v3102_v5  ;;  %v3318_v5 = vor.u32 %v3573_v62, %v3315_v42  ;;  %v3382_v11 = vor.u32 %v3589_v0, %v3379_v43  ;;  %v3563_v62 = vld [vmem:[%s4165_s20 + $0x314] sm:$0xf]  ;;  %v3275_v42 = vld [vmem:[%s4165_s20 + $0x318] sm:$0xf0] }
 0x263   : > { %2324 = vmatpush.bf16.msra.mxu0 %v2902_v13  ;;  %v3571_v13 = vld [vmem:[%s4165_s20 + $0x354] sm:$0xf]  ;;  %v3339_v43 = vld [vmem:[%s4165_s20 + $0x398] sm:$0xf0] }
 0x264   : > { %2337 = vmatpush.bf16.msra.mxu1 %v2966_v15  ;;  %v3307_v15 = vld [vmem:[%s4165_s20 + $0x358] sm:$0xf0]  ;;  %v3579_v0 = vld [vmem:[%s4165_s20 + $0x394] sm:$0xf] }
 0x265   : > { %2350 = vmatpush.bf16.msra.mxu2 %v3030_v17  ;;  %v3587_v17 = vld [vmem:[%s4165_s20 + $0x3d4] sm:$0xf]  ;;  %v3310_v25 = vor.u32 %v3571_v13, %v3307_v15  ;;  %v3561_v13 = vld [vmem:[%s4165_s20 + $0x304] sm:$0xf]  ;;  %v3267_v15 = vld [vmem:[%s4165_s20 + $0x308] sm:$0xf0] }
 0x266   : > { %2363 = vmatpush.bf16.msra.mxu3 %v3094_v27  ;;  %v3537_v27 = vld [vmem:[%s4165_s20 + $0x244] sm:$0xf]  ;;  %v3374_v32 = vor.u32 %v3587_v17, %v3371_v23  ;;  %v3331_v23 = vld [vmem:[%s4165_s20 + $0x388] sm:$0xf0] }
 0x267   : > { %2325 = vmatpush.bf16.msra.mxu0 %v2894_v40  ;;  %v3577_v17 = vld [vmem:[%s4165_s20 + $0x384] sm:$0xf] }
 0x268   : > { %2338 = vmatpush.bf16.msra.mxu1 %v2958_v46  ;;  %v3535_v46 = vld [vmem:[%s4165_s20 + $0x234] sm:$0xf] }
 0x269   : > { %2351 = vmatpush.bf16.msra.mxu2 %v3022_v47  ;;  %v3163_v47 = vld [vmem:[%s4165_s20 + $0x238] sm:$0xf0] }
 0x26a   : > { %2364 = vmatpush.bf16.msra.mxu3 %v3086_v52  ;;  %v3567_v52 = vld [vmem:[%s4165_s20 + $0x334] sm:$0xf]  ;;  %v3166_v63 = vor.u32 %v3535_v46, %v3163_v47 }
 0x26b   : > { %2326 = vmatpush.bf16.msra.mxu0 %v2886_v2  ;;  %v3294_v10 = vor.u32 %v3567_v52, %v3291_v53  ;;  %v3533_v2 = vld [vmem:[%s4165_s20 + $0x224] sm:$0xf] }
 0x26c   : > { %2339 = vmatpush.bf16.msra.mxu1 %v2950_v58  ;;  %v3219_v58 = vld [vmem:[%s4165_s20 + $0x2a8] sm:$0xf0] }
 0x26d   : > { %2352 = vmatpush.bf16.msra.mxu2 %v3014_v59  ;;  %v3565_v59 = vld [vmem:[%s4165_s20 + $0x324] sm:$0xf] }
 0x26e   : > { %2365 = vmatpush.bf16.msra.mxu3 %v3078_v61  ;;  %2327 = vmatmul.bf16.vlgmr.msra.gmra.mxu0 %v4488_v20  ;;  %v3569_v20 = vld [vmem:[%s4165_s20 + $0x344] sm:$0xf]  ;;  %v3347_v61 = vld [vmem:[%s4165_s20 + $0x3a8] sm:$0xf0] }
 0x26f   : > { %2371 = vmatpush.bf16.msrb.mxu0 %v3198_v19  ;;  %2340 = vmatmul.bf16.vlgmr.msra.gmra.mxu1 %v4495_v26  ;;  %v3363_v26 = vld [vmem:[%s4165_s20 + $0x3c8] sm:$0xf0]  ;;  %v3302_v45 = vor.u32 %v3569_v20, %v3299_v29  ;;  %v3158_v19 = vor.u32 %v3533_v2, %v3155_v14 }
 0x270   : > { %2384 = vmatpush.bf16.msrb.mxu1 %v3262_v28  ;;  %2353 = vmatmul.bf16.vlgmr.msra.gmra.mxu2 %v4486_v18  ;;  %v3246_v18 = vor.u32 %v3555_v9, %v3243_v12  ;;  %v3366_v49 = vor.u32 %v3585_v33, %v3363_v26  ;;  %v3222_v28 = vor.u32 %v3549_v16, %v3219_v58  ;;  %v3545_v9 = vld [vmem:[%s4165_s20 + $0x284] sm:$0xf]  ;;  %v3203_v12 = vld [vmem:[%s4165_s20 + $0x288] sm:$0xf0] }
 0x271   : > { %2397 = vmatpush.bf16.msrb.mxu2 %v3326_v22  ;;  %2366 = vmatmul.bf16.vlgmr.msra.gmra.mxu3 %v4490_v21  ;;  %v3171_v21 = vld [vmem:[%s4165_s20 + $0x248] sm:$0xf0]  ;;  %v3286_v22 = vor.u32 %v3565_v59, %v3283_v37 }
 0x272   : > { %2410 = vmatpush.bf16.msrb.mxu3 %v3390_v38  ;;  %v3174_v40 = vor.u32 %v3537_v27, %v3171_v21  ;;  %v3350_v38 = vor.u32 %v3581_v60, %v3347_v61  ;;  %v3334_v27 = vor.u32 %v3577_v17, %v3331_v23  ;;  %v1551_v21 = vld [vmem:[%s4172_s8] sm:$0x3]  ;;  %s3894_s8 = scalar_lea.hbm %s4716_s7, 8 }
 0x273   : > { %2372 = vmatpush.bf16.msrb.mxu0 %v3190_v3  ;;  %v3150_v3 = vor.u32 %v3531_v34, %v3147_v50  ;;  %v2211_v30 = vperm.slane %v1551_v21, 0  ;;  %p3896_p2 = scmp.lt.s32.totalorder %s3894_s8, %s3890_s18 }
 0x274   : > { %2385 = vmatpush.bf16.msrb.mxu1 %v3254_v4  ;;  %v3214_v4 = vor.u32 %v3547_v54, %v3211_v6 }
 0x275   : > { %2398 = vmatpush.bf16.msrb.mxu2 %v3318_v5  ;;  %v3278_v5 = vor.u32 %v3563_v62, %v3275_v42  ;;  %p3897_p8 = por %p3896_p2, %p3895_p10 }
 0x276   : > { %2411 = vmatpush.bf16.msrb.mxu3 %v3382_v11  ;;  %v3342_v11 = vor.u32 %v3579_v0, %v3339_v43  ;;  %v2429_v0 = vlaneseq }
 0x277   : > { %2373 = vmatpush.bf16.msrb.mxu0 %v3182_v24  ;;  %v3142_v24 = vor.u32 %v3529_v7, %v3139_v8  ;;  %p3898_p3 = pnand %p3897_p8, %p3893_p9 }
 0x278   : > { %2386 = vmatpush.bf16.msrb.mxu1 %v3246_v18  ;;  %v3206_v18 = vor.u32 %v3545_v9, %v3203_v12  ;;  %vm2431_vm4 = vcmp.lt.s32.totalorder %v2429_v0, 256 }
 0x279   : > { %2399 = vmatpush.bf16.msrb.mxu2 %v3310_v25  ;;  %v3270_v25 = vor.u32 %v3561_v13, %v3267_v15 }
 0x27a   : > { %2412 = vmatpush.bf16.msrb.mxu3 %v3374_v32 }
 0x27b   : > { %2374 = vmatpush.bf16.msrb.mxu0 %v3174_v40 }
 0x27c   : > { %2387 = vmatpush.bf16.msrb.mxu1 %v3238_v41 }
 0x27d   : > { %2400 = vmatpush.bf16.msrb.mxu2 %v3302_v45 }
 0x27e   : > { %2413 = vmatpush.bf16.msrb.mxu3 %v3366_v49 }
 0x27f   : > { %2375 = vmatpush.bf16.msrb.mxu0 %v3166_v63 }
 0x280   : > { %2388 = vmatpush.bf16.msrb.mxu1 %v3230_v57 }
 0x281   : > { %2401 = vmatpush.bf16.msrb.mxu2 %v3294_v10 }
 0x282   : > { %2414 = vmatpush.bf16.msrb.mxu3 %v3358_v39  ;;  %v2212_v39 = vperm.slane %v1551_v21, 1 }
 0x283   : > { %2376 = vmatpush.bf16.msrb.mxu0 %v3158_v19 }
 0x284   : > { %2389 = vmatpush.bf16.msrb.mxu1 %v3222_v28 }
 0x285   : > { %2402 = vmatpush.bf16.msrb.mxu2 %v3286_v22 }
 0x286   : > { %2415 = vmatpush.bf16.msrb.mxu3 %v3350_v38 }
 0x287   : > { %2377 = vmatpush.bf16.msrb.mxu0 %v3150_v3 }
 0x288   : > { %2390 = vmatpush.bf16.msrb.mxu1 %v3214_v4 }
 0x289   : > { %2403 = vmatpush.bf16.msrb.mxu2 %v3278_v5 }
 0x28a   : > { %2416 = vmatpush.bf16.msrb.mxu3 %v3342_v11 }
 0x28b   : > { %2378 = vmatpush.bf16.msrb.mxu0 %v3142_v24 }
 0x28c   : > { %2391 = vmatpush.bf16.msrb.mxu1 %v3206_v18 }
 0x28d   : > { %2404 = vmatpush.bf16.msrb.mxu2 %v3270_v25 }
 0x28e   : > { %2417 = vmatpush.bf16.msrb.mxu3 %v3334_v27  ;;  %2379 = vmatmul.bf16.vlgmr.msrb.gmra.mxu0 %v4545_v1 }
 0x28f   : > { %2392 = vmatmul.bf16.vlgmr.msrb.gmra.mxu1 %v4551_v44 }
 0x290   : > { %2405 = vmatmul.bf16.vlgmr.msrb.gmra.mxu2 %v4542_v31 }
 0x291   : > { %2418 = vmatmul.bf16.vlgmr.msrb.gmra.mxu3 %v4547_v36 }
 0x2ae   : > { %v2224_v32 = vpop.f32.mrf.mxu0 }
 0x2af   : > { %v2225_v35 = vadd.f32 %v2224_v32, %v2211_v30 }
 0x2b2   : > { %v2237_v20 = vpop.f32.mrf.mxu1 }
 0x2b3   : > { %v2238_v29 = vadd.f32 %v2237_v20, %v2225_v35 }
 0x2b5   : > { %v2250_v33 = vpop.f32.mrf.mxu2 }
 0x2b6   : > { %v2251_v26 = vadd.f32 %v2250_v33, %v2238_v29  ;;  %v2263_v40 = vpop.f32.mrf.mxu3  ;;  %v2226_v45 = vpop.f32.mrf.mxu0 }
 0x2b8   : > { %v2264_v41 = vadd.f32 %v2263_v40, %v2251_v26 }
 0x2ba   : > { %v2239_v46 = vpop.f32.mrf.mxu1 }
 0x2bd   : > { %v2252_v47 = vpop.f32.mrf.mxu2 }
 0x2be   : > { %v2265_v1 = vpop.f32.mrf.mxu3 }
 0x2cb   : > { %v2276_v48 = vpop.f32.mrf.mxu0 }
 0x2cc   : > { %v2277_v44 = vadd.f32 %v2276_v48, %v2264_v41  ;;  %v2289_v49 = vpop.f32.mrf.mxu1 }
 0x2ce   : > { %v2290_v31 = vadd.f32 %v2289_v49, %v2277_v44 }
 0x2d3   : > { %v2302_v51 = vpop.f32.mrf.mxu2  ;;  %v2278_v52 = vpop.f32.mrf.mxu0 }
 0x2d4   : > { %v2315_v36 = vpop.f32.mrf.mxu3  ;;  %v2291_v53 = vpop.f32.mrf.mxu1  ;;  %v2303_v38 = vadd.f32 %v2302_v51, %v2290_v31 }
 0x2d6   : > { %v2316_v4 = vadd.f32 %v2315_v36, %v2303_v38 }
 0x2db   : > { %v2304_v55 = vpop.f32.mrf.mxu2 }
 0x2dc   : > { %v2317_v56 = vpop.f32.mrf.mxu3 }
 0x2eb   : > { %v2328_v63 = vpop.f32.mrf.mxu0 }
 0x2ec   : > { %v2341_v57 = vpop.f32.mrf.mxu1  ;;  %v2329_v37 = vadd.f32 %v2328_v63, %v2212_v39 }
 0x2ee   : > { %v2342_v60 = vadd.f32 %v2341_v57, %v2329_v37 }
 0x2f3   : > { %v2354_v10 = vpop.f32.mrf.mxu2  ;;  %v2330_v14 = vpop.f32.mrf.mxu0 }
 0x2f4   : > { %v2367_v2 = vpop.f32.mrf.mxu3  ;;  %v2343_v16 = vpop.f32.mrf.mxu1  ;;  %v2355_v61 = vadd.f32 %v2354_v10, %v2342_v60 }
 0x2f6   : > { %v2368_v19 = vadd.f32 %v2367_v2, %v2355_v61 }
 0x2fb   : > { %v2356_v58 = vpop.f32.mrf.mxu2 }
 0x2fc   : > { %v2369_v59 = vpop.f32.mrf.mxu3 }
 0x30b   : > { %v2380_v28 = vpop.f32.mrf.mxu0 }
 0x30c   : > { %v2393_v22 = vpop.f32.mrf.mxu1  ;;  %v2381_v34 = vadd.f32 %v2380_v28, %v2368_v19 }
 0x30e   : > { %v2394_v50 = vadd.f32 %v2393_v22, %v2381_v34 }
 0x313   : > { %v2406_v54 = vpop.f32.mrf.mxu2  ;;  %v2382_v42 = vpop.f32.mrf.mxu0 }
 0x314   : > { %v2407_v6 = vadd.f32 %v2406_v54, %v2394_v50  ;;  %v2419_v62 = vpop.f32.mrf.mxu3  ;;  %v2395_v43 = vpop.f32.mrf.mxu1 }
 0x316   : > { %v2420_v3 = vadd.f32 %v2419_v62, %v2407_v6 }
 0x318   : > { %v2425_v5 = vrot.slane %v2420_v3, 7 }
 0x31a   : > { %v2427_v7 = vsel %vm2426_vm0, %v2316_v4, %v2425_v5 }
 0x31b   : > { %v2408_v8 = vpop.f32.mrf.mxu2  ;;  %2433 = vst.msk [vmem:[%s4174_s9] sm:$0x3] %vm2431_vm4, %v2427_v7 }
 0x31c   : > { %v2421_v9 = vpop.f32.mrf.mxu3 }
 0x31d   : > { %3901 = shalt.err (!%p3898_p3)
}
 0x31e   : > { %3615 = dma.vmem_to_hbm [thread:$0]  (%p4056_p11), %s2448_s11, 32, %s2450_s15, %s2435_s28  }
 0x31f PF: > { %s4758_s29 = sld [smem:[#allocation20_spill]]  ;;  %p3650_p4 = scmp.ge.s32.totalorder %s3952_s27, 2 }
 0x321   : > { %p3638_p1 = pnand %p3650_p4, %p4060_p12 }
 0x323   : > { %p3639_p5 = pneg %p3638_p1 }
 0x325   : > { %s2461_s23 = sand.u32 1, %s4758_s29  }
 0x326   : > { %s2462_s17 = scalar_lea.sflag [#allocation6], %s2461_s23 }
 0x327   : > { %3935 = dma.done.wait (%p3639_p5), %s2462_s17, 32  }
 0x328   : > { %3937 = vsyncadd (%p3639_p5), %s2462_s17, 4294967264  ;;  %s4760_s27 = sld [smem:[#allocation21_spill]]  ;;  %s4762_s24 = smov %s3944_s25 }
 0x329   : > { %s4761_s14 = sld [smem:[#allocation22_spill]]  ;;  %s4763_s25 = smov %s3948_s26 }
 0x32e   : > { %p20_p7 = scmp.ge.s32.totalorder %s4760_s27, 6  }
 0x32f   : > { %s4764_s26 = smov %s4761_s14 }
 0x330   :  { %22 = sbr.rel (!%p20_p7) target bundleno = 10 (0xa), region = 123 }
 0x335   :  { %2468 = vsyncpa [#allocation5], 1 }
 0x336   :  { %2470 = vsyncpa [#allocation5 + $0x1], 1 }
 0x337   :  { %2471 = vsyncpa [#allocation8], 1 }
 0x338   :  { %2472 = vsyncpa [#allocation11], 1 }
 0x339   :  { %2473 = vsyncpa [#allocation6], 1 }
 0x33a   :  { %2475 = vsyncpa [#allocation6 + $0x1], 1 }

</bundles_post_ra>
